<compile_context>
chip_gen: v5e
topology: v5e:2x2
jax: 0.10.0
libtpu: 0.0.40
codegen_flags: <defaults>
</compile_context>

<pallas_src>
import numpy as np
import jax
import jax.numpy as jnp
from jax.experimental import pallas as pl
from jax.experimental.pallas import tpu as pltpu


# ------------------------------------------------------------- host helpers -
def idft_ortho_c(n):
    """Orthonormal inverse-DFT matrix F[m, k] = exp(+2*pi*i*m*k/n) / sqrt(n)."""
    k = np.arange(n)
    return np.exp(2j * np.pi * np.outer(k, k) / n) / np.sqrt(n)


def center_mask(h, w, cuton):
    """Mask equivalent to fftshift -> zero centre rect -> ifftshift (rolls cancel)."""
    cy, cx = int(h / 2), int(w / 2)
    rh, rw = int(cuton * cy), int(cuton * cx)
    nsh = h // 2 + (1 if h % 2 != 0 else 0)   # fftshift roll amount (dim H)
    nsw = w // 2 + (1 if w % 2 != 0 else 0)   # fftshift roll amount (dim W)
    sh = (np.arange(h) - nsh) % h             # shifted position of index i
    sw = (np.arange(w) - nsw) % w
    zero = ((sh >= cy - rh) & (sh < cy + rh))[:, None] & \
           ((sw >= cx - rw) & (sw < cx + rw))[None, :]
    return np.where(zero, 0.0, 1.0).astype(np.float32)


def fftn_all_ortho(x):
    """torch.fft.fftn(x, norm='ortho') over ALL 4 axes, via two rank-2 FFTs."""
    x_ft = jnp.fft.fftn(x.astype(jnp.complex64), axes=(-2, -1), norm='ortho')
    return jnp.fft.fftn(x_ft, axes=(0, 1), norm='ortho')


def init_params(key, c_in, c_out, shapes):
    k1, k2, k3, k4 = jax.random.split(key, 4)
    scale = 1.0 / (c_in * c_out)
    w1r = scale * jax.random.uniform(k1, (c_in, c_out, shapes, shapes), jnp.float32)
    w1i = scale * jax.random.uniform(k2, (c_in, c_out, shapes, shapes), jnp.float32)
    bound = 1.0 / np.sqrt(c_in)
    w0 = jax.random.uniform(k3, (c_out, c_in), jnp.float32, -bound, bound)
    bias = jax.random.uniform(k4, (c_out,), jnp.float32, -bound, bound)
    rates = jnp.array([0.5, 0.5], jnp.float32)   # init_rate_half for rate1, rate2
    return (w1r, w1i, w0, bias, rates)


def precompute_fam_constants(params, H, W, cuton=0.1):
    """One-time prep: mask-folded bf16 weights, fused rate1*IDFT operator, rate2*conv."""
    w1r, w1i, w0, bias, rates = params
    C_in, C_out = int(w1r.shape[0]), int(w1r.shape[1])
    HW = H * W
    # NOTE: rates are folded into constants (exact while frozen; refold if trained).
    rate1, rate2 = float(rates[0]), float(rates[1])

    # fold the roll-cancelled frequency mask into the spectral weights (exact)
    mask = jnp.asarray(center_mask(H, W, cuton))                       # (H, W)
    wrm = (w1r * mask[None, None]).reshape(C_in, C_out, HW)
    wim = (w1i * mask[None, None]).reshape(C_in, C_out, HW)
    wcat = jnp.stack([wrm, wim], axis=0).astype(jnp.bfloat16)          # (2, C_in, C_out, HW)

    # fused complex->real orthonormal 2-D inverse DFT (+ rate1):
    #   Re(out) = [zr | -zi] @ [Re(K); Im(K)],  K = kron(Fh, Fw)  (row-major vec)
    Kc = np.kron(idft_ortho_c(H), idft_ortho_c(W))                     # (HW, HW) complex
    kbig = jnp.asarray(rate1 * np.concatenate([Kc.real, Kc.imag], axis=0).astype(np.float32),
                       dtype=jnp.bfloat16)                             # (2*HW, HW)

    # 1x1 conv constants with rate2 folded; last row is the bias
    w0b = jnp.concatenate([rate2 * jnp.transpose(w0), rate2 * bias[None, :]], axis=0)
    w0b = w0b[:, :, None].astype(jnp.float32)                          # (C_in+1, C_out, 1)

    return dict(wcat=wcat, kbig=kbig, w0b=w0b, shape=(C_in, C_out, H, W))


def pick_batch_tile(B, C_out):
    """Fold batches per grid step so the matmul LHS fills >= 8 sublanes.

    TODO(synk): on v7x (2 TensorCores), once B is large enough cap `bt` so the
    grid keeps >= 2 parallel steps while still filling the MXU rows.
    """
    bt = max(1, -(-8 // C_out))
    bt = min(bt, B)
    while bt < B and (bt * C_out) % 8 != 0:
        bt += 1
    return bt


# ---------------------------------------------------------------- kernel ----
def _make_kernel(C_in, C_out, HW, bt):
    def fam_kernel(xin_ref,     # (bt, 3*C_in, HW) f32: [Re(x_ft); Im(x_ft); x]
                   wcat_ref,    # (2, C_in, C_out, HW) bf16 masked spectral weights
                   kbig_ref,    # (2*HW, HW) bf16   rate1*[Re(K); Im(K)]
                   w0b_ref,     # (C_in+1, C_out, 1) f32   rate2*[w0^T; bias]
                   out_ref,     # (bt*C_out, HW) f32
                   lhs_sc):     # VMEM scratch (bt*C_out, 2*HW) f32
        # hoisted once: bf16 -> f32 up-cast of the masked spectral weights
        wr = wcat_ref[0].astype(jnp.float32)                  # (C_in, C_out, HW)
        wi = wcat_ref[1].astype(jnp.float32)

        # stage the fused-matmul LHS [zr | -zi] for all folded batch elements
        for b in range(bt):                                   # unrolled, bt is small
            xr = xin_ref[b, 0:C_in, :]                        # (C_in, HW)  Re(x_ft)
            xi = xin_ref[b, C_in:2 * C_in, :]                 #             Im(x_ft)
            # complex channel mixing (mask already folded into wr/wi), VPU f32
            zr = jnp.sum(xr[:, None, :] * wr - xi[:, None, :] * wi, axis=0)  # (C_out, HW)
            zi = jnp.sum(xr[:, None, :] * wi + xi[:, None, :] * wr, axis=0)
            lhs_sc[b * C_out:(b + 1) * C_out, 0:HW] = zr
            lhs_sc[b * C_out:(b + 1) * C_out, HW:2 * HW] = -zi

        # ONE MXU matmul: rate1 * Re(IDFT2(z)) for every folded batch & channel
        spec = jnp.dot(lhs_sc[...].astype(jnp.bfloat16), kbig_ref[...],
                       preferred_element_type=jnp.float32)    # (bt*C_out, HW)

        # 1x1-conv path as C_in VPU FMAs (rate2 and bias pre-folded) + epilogue
        for b in range(bt):
            xx = xin_ref[b, 2 * C_in:3 * C_in, :]             # (C_in, HW)  x
            conv = w0b_ref[C_in]                              # (C_out, 1) = rate2*bias
            for i in range(C_in):
                conv = conv + w0b_ref[i] * xx[i:i + 1, :]     # (C_out, HW)
            out_ref[b * C_out:(b + 1) * C_out, :] = \
                spec[b * C_out:(b + 1) * C_out, :] + conv

    return fam_kernel


# ------------------------------------------------------------- host glue ----
def _const_spec(shape):
    """Grid-invariant operand: constant index map, single-buffered when possible."""
    nd = len(shape)
    idx = lambda *_: (0,) * nd
    if hasattr(pl, "Buffered"):
        try:
            return pl.BlockSpec(shape, idx, pipeline_mode=pl.Buffered(1))
        except TypeError:
            pass
    return pl.BlockSpec(shape, idx)


def fam_forward(x, consts, batch_tile=None):
    C_in, C_out, H, W = consts["shape"]
    B = x.shape[0]
    HW = H * W

    # forward 4-D orthonormal FFT (no Pallas FFT primitive) -> plain-JAX glue
    x_ft = fftn_all_ortho(x)

    # single per-batch operand [Re(x_ft); Im(x_ft); x] -> one input DMA per step
    xin = jnp.concatenate(
        [jnp.real(x_ft).reshape(B, C_in, HW),
         jnp.imag(x_ft).reshape(B, C_in, HW),
         x.reshape(B, C_in, HW).astype(jnp.float32)], axis=1)          # (B, 3*C_in, HW)

    bt = batch_tile if batch_tile is not None else pick_batch_tile(B, C_out)
    n_steps = pl.cdiv(B, bt)
    B_pad = n_steps * bt
    if B_pad != B:
        xin = jnp.pad(xin, ((0, B_pad - B), (0, 0), (0, 0)))

    kernel = _make_kernel(C_in, C_out, HW, bt)

    grid_spec = pltpu.PrefetchScalarGridSpec(
        num_scalar_prefetch=0,
        grid=(n_steps,),
        in_specs=[
            pl.BlockSpec((bt, 3 * C_in, HW), lambda c: (c, 0, 0)),     # per-chunk inputs
            _const_spec((2, C_in, C_out, HW)),                         # masked weights (bf16)
            _const_spec((2 * HW, HW)),                                 # rate1*[Re(K);Im(K)] (bf16)
            _const_spec((C_in + 1, C_out, 1)),                         # rate2*[w0^T; bias]
        ],
        out_specs=pl.BlockSpec((bt * C_out, HW), lambda c: (c, 0)),
        scratch_shapes=[pltpu.VMEM((bt * C_out, 2 * HW), jnp.float32)],
    )

    out2d = pl.pallas_call(
        kernel,
        out_shape=jax.ShapeDtypeStruct((B_pad * C_out, HW), jnp.float32),
        grid_spec=grid_spec,
        compiler_params=pltpu.CompilerParams(
            dimension_semantics=("parallel",)),
    )(xin, consts["wcat"], consts["kbig"], consts["w0b"])

    return out2d[:B * C_out].reshape(B, C_out, H, W)


# ----------------------------------------------------- pure-JAX reference ----
def fam_reference(x, params, cuton=0.1):
    w1r, w1i, w0, bias, rates = params
    B, C_in, H, W = x.shape
    x_ft = fftn_all_ortho(x)
    weights = (w1r + 1j * w1i).astype(jnp.complex64)
    out_ft = jnp.einsum('bixy,ioxy->boxy', x_ft, weights)
    real, imag = jnp.real(out_ft), jnp.imag(out_ft)
    # batch_fftshift2d (rolls over dims 1,2,3)
    for dim in range(1, 4):
        n = real.shape[dim] // 2
        if real.shape[dim] % 2 != 0:
            n += 1
        real = jnp.roll(real, -n, axis=dim)
        imag = jnp.roll(imag, -n, axis=dim)
    cy, cx = int(H / 2), int(W / 2)
    rh, rw = int(cuton * cy), int(cuton * cx)
    zmask = np.ones((H, W), np.float32)
    zmask[cy - rh:cy + rh, cx - rw:cx + rw] = 0.0
    real = real * zmask[None, None]
    imag = imag * zmask[None, None]
    # batch_ifftshift2d (rolls over dims 3,2,1)
    for dim in range(3, 0, -1):
        n = real.shape[dim] // 2
        real = jnp.roll(real, -n, axis=dim)
        imag = jnp.roll(imag, -n, axis=dim)
    out_ft2 = real + 1j * imag
    out = jnp.real(jnp.fft.ifft2(out_ft2, s=(H, W), norm='ortho'))
    out2 = jnp.einsum('oi,bihw->bohw', w0, x) + bias[None, :, None, None]
    return rates[0] * out + rates[1] * out2


# ----------------------------------------------------------------- main -----
if __name__ == "__main__":
    B, C_in, C_out, H, W = 2, 4, 4, 16, 16     # module requires shapes == H == W
    cuton = 0.25                               # non-empty zero band at 16x16
    key = jax.random.PRNGKey(0)
    kx, kp = jax.random.split(key)
    x = jax.random.normal(kx, (B, C_in, H, W), jnp.float32)
    params = init_params(kp, C_in, C_out, shapes=H)

    consts = precompute_fam_constants(params, H, W, cuton)   # once, outside forward
    y = jax.block_until_ready(fam_forward(x, consts))

    y_ref = jax.block_until_ready(fam_reference(x, params, cuton))
    assert y.shape == (B, C_out, H, W)
    max_err = float(jnp.max(jnp.abs(y - y_ref)))
    assert np.allclose(np.asarray(y), np.asarray(y_ref), atol=1e-2, rtol=1e-2), \
        f"Pallas kernel does not match pure-JAX reference (max abs err = {max_err})"

    print("KERNEL_OK")
</pallas_src>

<mosaic_0001>
module attributes {stable_mosaic.version = 11 : i64} {
  func.func @fam_kernel(%arg0: i32, %arg1: memref<2x12x256xf32, #tpu.memory_space<vmem>>, %arg2: memref<2x4x4x256xbf16, #tpu.memory_space<vmem>>, %arg3: memref<512x256xbf16, #tpu.memory_space<vmem>>, %arg4: memref<5x4x1xf32, #tpu.memory_space<vmem>>, %arg5: memref<8x256xf32, #tpu.memory_space<vmem>>, %arg6: memref<8x512xf32, #tpu.memory_space<vmem>>) attributes {dimension_semantics = [#tpu.dimension_semantics<parallel>], iteration_bounds = array<i64: 1>, scalar_prefetch = 0 : i64, scratch_operands = 1 : i64, tpu.core_type = #tpu.core_type<tc>, window_params = [{transform_indices = @transform_0, window_bounds = array<i64: 2, 12, 256>}, {pipeline_mode = #tpu.pipeline_mode<synchronous>, transform_indices = @transform_1, window_bounds = array<i64: 2, 4, 4, 256>}, {pipeline_mode = #tpu.pipeline_mode<synchronous>, transform_indices = @transform_2, window_bounds = array<i64: 512, 256>}, {pipeline_mode = #tpu.pipeline_mode<synchronous>, transform_indices = @transform_3, window_bounds = array<i64: 5, 4, 1>}, {transform_indices = @transform_4, window_bounds = array<i64: 8, 256>}]} {
    %c0 = arith.constant 0 : index
    %c0_0 = arith.constant 0 : index
    %c0_1 = arith.constant 0 : index
    %c0_2 = arith.constant 0 : index
    %0 = vector.load %arg2[%c0, %c0_0, %c0_1, %c0_2] : memref<2x4x4x256xbf16, #tpu.memory_space<vmem>>, vector<1x4x4x256xbf16>
    %1 = vector.shape_cast %0 : vector<1x4x4x256xbf16> to vector<4x4x256xbf16>
    %2 = arith.extf %1 : vector<4x4x256xbf16> to vector<4x4x256xf32>
    %c1 = arith.constant 1 : index
    %c0_3 = arith.constant 0 : index
    %c0_4 = arith.constant 0 : index
    %c0_5 = arith.constant 0 : index
    %3 = vector.load %arg2[%c1, %c0_3, %c0_4, %c0_5] : memref<2x4x4x256xbf16, #tpu.memory_space<vmem>>, vector<1x4x4x256xbf16>
    %4 = vector.shape_cast %3 : vector<1x4x4x256xbf16> to vector<4x4x256xbf16>
    %5 = arith.extf %4 : vector<4x4x256xbf16> to vector<4x4x256xf32>
    %c0_6 = arith.constant 0 : index
    %c0_7 = arith.constant 0 : index
    %c0_8 = arith.constant 0 : index
    %6 = vector.load %arg1[%c0_6, %c0_7, %c0_8] : memref<2x12x256xf32, #tpu.memory_space<vmem>>, vector<1x4x256xf32>
    %7 = vector.shape_cast %6 : vector<1x4x256xf32> to vector<4x256xf32>
    %c0_9 = arith.constant 0 : index
    %c4 = arith.constant 4 : index
    %c0_10 = arith.constant 0 : index
    %8 = vector.load %arg1[%c0_9, %c4, %c0_10] : memref<2x12x256xf32, #tpu.memory_space<vmem>>, vector<1x4x256xf32>
    %9 = vector.shape_cast %8 : vector<1x4x256xf32> to vector<4x256xf32>
    %10 = vector.shape_cast %7 : vector<4x256xf32> to vector<4x1x256xf32>
    %11 = vector.broadcast %10 : vector<4x1x256xf32> to vector<4x4x256xf32>
    %12 = arith.mulf %11, %2 : vector<4x4x256xf32>
    %13 = vector.shape_cast %9 : vector<4x256xf32> to vector<4x1x256xf32>
    %14 = vector.broadcast %13 : vector<4x1x256xf32> to vector<4x4x256xf32>
    %15 = arith.mulf %14, %5 : vector<4x4x256xf32>
    %16 = arith.subf %12, %15 : vector<4x4x256xf32>
    %cst = arith.constant dense<0.000000e+00> : vector<4x256xf32>
    %17 = vector.multi_reduction <add>, %16, %cst [0] : vector<4x4x256xf32> to vector<4x256xf32>
    %18 = vector.shape_cast %7 : vector<4x256xf32> to vector<4x1x256xf32>
    %19 = vector.broadcast %18 : vector<4x1x256xf32> to vector<4x4x256xf32>
    %20 = arith.mulf %19, %5 : vector<4x4x256xf32>
    %21 = vector.shape_cast %9 : vector<4x256xf32> to vector<4x1x256xf32>
    %22 = vector.broadcast %21 : vector<4x1x256xf32> to vector<4x4x256xf32>
    %23 = arith.mulf %22, %2 : vector<4x4x256xf32>
    %24 = arith.addf %20, %23 : vector<4x4x256xf32>
    %cst_11 = arith.constant dense<0.000000e+00> : vector<4x256xf32>
    %25 = vector.multi_reduction <add>, %24, %cst_11 [0] : vector<4x4x256xf32> to vector<4x256xf32>
    %c0_12 = arith.constant 0 : index
    %c0_13 = arith.constant 0 : index
    %26 = vector.load %arg6[%c0_12, %c0_13] : memref<8x512xf32, #tpu.memory_space<vmem>>, vector<4x256xf32>
    tpu.vector_store %arg6[%c0_12, %c0_13], %17 {strides = array<i32>} : memref<8x512xf32, #tpu.memory_space<vmem>>, vector<4x256xf32>,
    %cst_14 = arith.constant 0.000000e+00 : f32
    %27 = vector.broadcast %cst_14 : f32 to vector<4x256xf32>
    %28 = arith.subf %27, %25 : vector<4x256xf32>
    %c0_15 = arith.constant 0 : index
    %c256 = arith.constant 256 : index
    %29 = vector.load %arg6[%c0_15, %c256] : memref<8x512xf32, #tpu.memory_space<vmem>>, vector<4x256xf32>
    tpu.vector_store %arg6[%c0_15, %c256], %28 {strides = array<i32>} : memref<8x512xf32, #tpu.memory_space<vmem>>, vector<4x256xf32>,
    %c1_16 = arith.constant 1 : index
    %c0_17 = arith.constant 0 : index
    %c0_18 = arith.constant 0 : index
    %30 = vector.load %arg1[%c1_16, %c0_17, %c0_18] : memref<2x12x256xf32, #tpu.memory_space<vmem>>, vector<1x4x256xf32>
    %31 = vector.shape_cast %30 : vector<1x4x256xf32> to vector<4x256xf32>
    %c1_19 = arith.constant 1 : index
    %c4_20 = arith.constant 4 : index
    %c0_21 = arith.constant 0 : index
    %32 = vector.load %arg1[%c1_19, %c4_20, %c0_21] : memref<2x12x256xf32, #tpu.memory_space<vmem>>, vector<1x4x256xf32>
    %33 = vector.shape_cast %32 : vector<1x4x256xf32> to vector<4x256xf32>
    %34 = vector.shape_cast %31 : vector<4x256xf32> to vector<4x1x256xf32>
    %35 = vector.broadcast %34 : vector<4x1x256xf32> to vector<4x4x256xf32>
    %36 = arith.mulf %35, %2 : vector<4x4x256xf32>
    %37 = vector.shape_cast %33 : vector<4x256xf32> to vector<4x1x256xf32>
    %38 = vector.broadcast %37 : vector<4x1x256xf32> to vector<4x4x256xf32>
    %39 = arith.mulf %38, %5 : vector<4x4x256xf32>
    %40 = arith.subf %36, %39 : vector<4x4x256xf32>
    %cst_22 = arith.constant dense<0.000000e+00> : vector<4x256xf32>
    %41 = vector.multi_reduction <add>, %40, %cst_22 [0] : vector<4x4x256xf32> to vector<4x256xf32>
    %42 = vector.shape_cast %31 : vector<4x256xf32> to vector<4x1x256xf32>
    %43 = vector.broadcast %42 : vector<4x1x256xf32> to vector<4x4x256xf32>
    %44 = arith.mulf %43, %5 : vector<4x4x256xf32>
    %45 = vector.shape_cast %33 : vector<4x256xf32> to vector<4x1x256xf32>
    %46 = vector.broadcast %45 : vector<4x1x256xf32> to vector<4x4x256xf32>
    %47 = arith.mulf %46, %2 : vector<4x4x256xf32>
    %48 = arith.addf %44, %47 : vector<4x4x256xf32>
    %cst_23 = arith.constant dense<0.000000e+00> : vector<4x256xf32>
    %49 = vector.multi_reduction <add>, %48, %cst_23 [0] : vector<4x4x256xf32> to vector<4x256xf32>
    %c4_24 = arith.constant 4 : index
    %c0_25 = arith.constant 0 : index
    %50 = vector.load %arg6[%c4_24, %c0_25] : memref<8x512xf32, #tpu.memory_space<vmem>>, vector<4x256xf32>
    tpu.vector_store %arg6[%c4_24, %c0_25], %41 {strides = array<i32>} : memref<8x512xf32, #tpu.memory_space<vmem>>, vector<4x256xf32>,
    %cst_26 = arith.constant 0.000000e+00 : f32
    %51 = vector.broadcast %cst_26 : f32 to vector<4x256xf32>
    %52 = arith.subf %51, %49 : vector<4x256xf32>
    %c4_27 = arith.constant 4 : index
    %c256_28 = arith.constant 256 : index
    %53 = vector.load %arg6[%c4_27, %c256_28] : memref<8x512xf32, #tpu.memory_space<vmem>>, vector<4x256xf32>
    tpu.vector_store %arg6[%c4_27, %c256_28], %52 {strides = array<i32>} : memref<8x512xf32, #tpu.memory_space<vmem>>, vector<4x256xf32>,
    %c0_29 = arith.constant 0 : index
    %c0_30 = arith.constant 0 : index
    %54 = vector.load %arg6[%c0_29, %c0_30] : memref<8x512xf32, #tpu.memory_space<vmem>>, vector<8x512xf32>
    %55 = arith.truncf %54 : vector<8x512xf32> to vector<8x512xbf16>
    %c0_31 = arith.constant 0 : index
    %c0_32 = arith.constant 0 : index
    %56 = vector.load %arg3[%c0_31, %c0_32] : memref<512x256xbf16, #tpu.memory_space<vmem>>, vector<512x256xbf16>
    %cst_33 = arith.constant dense<0.000000e+00> : vector<8x256xf32>
    %57 = tpu.matmul %55, %56, %cst_33 {dimension_numbers = #tpu.dot_dimension_numbers<[1], [0], [0], [1], [0, 0, 1, 1], [], []>} : vector<8x512xbf16>, vector<512x256xbf16>, vector<8x256xf32> -> vector<8x256xf32>
    %c0_34 = arith.constant 0 : index
    %c8 = arith.constant 8 : index
    %c0_35 = arith.constant 0 : index
    %58 = vector.load %arg1[%c0_34, %c8, %c0_35] : memref<2x12x256xf32, #tpu.memory_space<vmem>>, vector<1x4x256xf32>
    %59 = vector.shape_cast %58 : vector<1x4x256xf32> to vector<4x256xf32>
    %c4_36 = arith.constant 4 : index
    %c0_37 = arith.constant 0 : index
    %c0_38 = arith.constant 0 : index
    %60 = vector.load %arg4[%c4_36, %c0_37, %c0_38] : memref<5x4x1xf32, #tpu.memory_space<vmem>>, vector<1x4x1xf32>
    %61 = vector.shape_cast %60 : vector<1x4x1xf32> to vector<4x1xf32>
    %c0_39 = arith.constant 0 : index
    %c0_40 = arith.constant 0 : index
    %c0_41 = arith.constant 0 : index
    %62 = vector.load %arg4[%c0_39, %c0_40, %c0_41] : memref<5x4x1xf32, #tpu.memory_space<vmem>>, vector<1x4x1xf32>
    %63 = vector.shape_cast %62 : vector<1x4x1xf32> to vector<4x1xf32>
    %64 = vector.extract_strided_slice %59 {offsets = [0, 0], sizes = [1, 256], strides = [1, 1]} : vector<4x256xf32> to vector<1x256xf32>
    %65 = vector.broadcast %63 : vector<4x1xf32> to vector<4x256xf32>
    %66 = vector.broadcast %64 : vector<1x256xf32> to vector<4x256xf32>
    %67 = arith.mulf %65, %66 : vector<4x256xf32>
    %68 = vector.broadcast %61 : vector<4x1xf32> to vector<4x256xf32>
    %69 = arith.addf %68, %67 : vector<4x256xf32>
    %c1_42 = arith.constant 1 : index
    %c0_43 = arith.constant 0 : index
    %c0_44 = arith.constant 0 : index
    %70 = vector.load %arg4[%c1_42, %c0_43, %c0_44] : memref<5x4x1xf32, #tpu.memory_space<vmem>>, vector<1x4x1xf32>
    %71 = vector.shape_cast %70 : vector<1x4x1xf32> to vector<4x1xf32>
    %72 = vector.extract_strided_slice %59 {offsets = [1, 0], sizes = [1, 256], strides = [1, 1]} : vector<4x256xf32> to vector<1x256xf32>
    %73 = vector.broadcast %71 : vector<4x1xf32> to vector<4x256xf32>
    %74 = vector.broadcast %72 : vector<1x256xf32> to vector<4x256xf32>
    %75 = arith.mulf %73, %74 : vector<4x256xf32>
    %76 = arith.addf %69, %75 : vector<4x256xf32>
    %c2 = arith.constant 2 : index
    %c0_45 = arith.constant 0 : index
    %c0_46 = arith.constant 0 : index
    %77 = vector.load %arg4[%c2, %c0_45, %c0_46] : memref<5x4x1xf32, #tpu.memory_space<vmem>>, vector<1x4x1xf32>
    %78 = vector.shape_cast %77 : vector<1x4x1xf32> to vector<4x1xf32>
    %79 = vector.extract_strided_slice %59 {offsets = [2, 0], sizes = [1, 256], strides = [1, 1]} : vector<4x256xf32> to vector<1x256xf32>
    %80 = vector.broadcast %78 : vector<4x1xf32> to vector<4x256xf32>
    %81 = vector.broadcast %79 : vector<1x256xf32> to vector<4x256xf32>
    %82 = arith.mulf %80, %81 : vector<4x256xf32>
    %83 = arith.addf %76, %82 : vector<4x256xf32>
    %c3 = arith.constant 3 : index
    %c0_47 = arith.constant 0 : index
    %c0_48 = arith.constant 0 : index
    %84 = vector.load %arg4[%c3, %c0_47, %c0_48] : memref<5x4x1xf32, #tpu.memory_space<vmem>>, vector<1x4x1xf32>
    %85 = vector.shape_cast %84 : vector<1x4x1xf32> to vector<4x1xf32>
    %86 = vector.extract_strided_slice %59 {offsets = [3, 0], sizes = [1, 256], strides = [1, 1]} : vector<4x256xf32> to vector<1x256xf32>
    %87 = vector.broadcast %85 : vector<4x1xf32> to vector<4x256xf32>
    %88 = vector.broadcast %86 : vector<1x256xf32> to vector<4x256xf32>
    %89 = arith.mulf %87, %88 : vector<4x256xf32>
    %90 = arith.addf %83, %89 : vector<4x256xf32>
    %91 = vector.extract_strided_slice %57 {offsets = [0, 0], sizes = [4, 256], strides = [1, 1]} : vector<8x256xf32> to vector<4x256xf32>
    %92 = arith.addf %91, %90 : vector<4x256xf32>
    %c0_49 = arith.constant 0 : index
    %c0_50 = arith.constant 0 : index
    %93 = vector.load %arg5[%c0_49, %c0_50] : memref<8x256xf32, #tpu.memory_space<vmem>>, vector<4x256xf32>
    tpu.vector_store %arg5[%c0_49, %c0_50], %92 {strides = array<i32>} : memref<8x256xf32, #tpu.memory_space<vmem>>, vector<4x256xf32>,
    %c1_51 = arith.constant 1 : index
    %c8_52 = arith.constant 8 : index
    %c0_53 = arith.constant 0 : index
    %94 = vector.load %arg1[%c1_51, %c8_52, %c0_53] : memref<2x12x256xf32, #tpu.memory_space<vmem>>, vector<1x4x256xf32>
    %95 = vector.shape_cast %94 : vector<1x4x256xf32> to vector<4x256xf32>
    %c4_54 = arith.constant 4 : index
    %c0_55 = arith.constant 0 : index
    %c0_56 = arith.constant 0 : index
    %96 = vector.load %arg4[%c4_54, %c0_55, %c0_56] : memref<5x4x1xf32, #tpu.memory_space<vmem>>, vector<1x4x1xf32>
    %97 = vector.shape_cast %96 : vector<1x4x1xf32> to vector<4x1xf32>
    %c0_57 = arith.constant 0 : index
    %c0_58 = arith.constant 0 : index
    %c0_59 = arith.constant 0 : index
    %98 = vector.load %arg4[%c0_57, %c0_58, %c0_59] : memref<5x4x1xf32, #tpu.memory_space<vmem>>, vector<1x4x1xf32>
    %99 = vector.shape_cast %98 : vector<1x4x1xf32> to vector<4x1xf32>
    %100 = vector.extract_strided_slice %95 {offsets = [0, 0], sizes = [1, 256], strides = [1, 1]} : vector<4x256xf32> to vector<1x256xf32>
    %101 = vector.broadcast %99 : vector<4x1xf32> to vector<4x256xf32>
    %102 = vector.broadcast %100 : vector<1x256xf32> to vector<4x256xf32>
    %103 = arith.mulf %101, %102 : vector<4x256xf32>
    %104 = vector.broadcast %97 : vector<4x1xf32> to vector<4x256xf32>
    %105 = arith.addf %104, %103 : vector<4x256xf32>
    %c1_60 = arith.constant 1 : index
    %c0_61 = arith.constant 0 : index
    %c0_62 = arith.constant 0 : index
    %106 = vector.load %arg4[%c1_60, %c0_61, %c0_62] : memref<5x4x1xf32, #tpu.memory_space<vmem>>, vector<1x4x1xf32>
    %107 = vector.shape_cast %106 : vector<1x4x1xf32> to vector<4x1xf32>
    %108 = vector.extract_strided_slice %95 {offsets = [1, 0], sizes = [1, 256], strides = [1, 1]} : vector<4x256xf32> to vector<1x256xf32>
    %109 = vector.broadcast %107 : vector<4x1xf32> to vector<4x256xf32>
    %110 = vector.broadcast %108 : vector<1x256xf32> to vector<4x256xf32>
    %111 = arith.mulf %109, %110 : vector<4x256xf32>
    %112 = arith.addf %105, %111 : vector<4x256xf32>
    %c2_63 = arith.constant 2 : index
    %c0_64 = arith.constant 0 : index
    %c0_65 = arith.constant 0 : index
    %113 = vector.load %arg4[%c2_63, %c0_64, %c0_65] : memref<5x4x1xf32, #tpu.memory_space<vmem>>, vector<1x4x1xf32>
    %114 = vector.shape_cast %113 : vector<1x4x1xf32> to vector<4x1xf32>
    %115 = vector.extract_strided_slice %95 {offsets = [2, 0], sizes = [1, 256], strides = [1, 1]} : vector<4x256xf32> to vector<1x256xf32>
    %116 = vector.broadcast %114 : vector<4x1xf32> to vector<4x256xf32>
    %117 = vector.broadcast %115 : vector<1x256xf32> to vector<4x256xf32>
    %118 = arith.mulf %116, %117 : vector<4x256xf32>
    %119 = arith.addf %112, %118 : vector<4x256xf32>
    %c3_66 = arith.constant 3 : index
    %c0_67 = arith.constant 0 : index
    %c0_68 = arith.constant 0 : index
    %120 = vector.load %arg4[%c3_66, %c0_67, %c0_68] : memref<5x4x1xf32, #tpu.memory_space<vmem>>, vector<1x4x1xf32>
    %121 = vector.shape_cast %120 : vector<1x4x1xf32> to vector<4x1xf32>
    %122 = vector.extract_strided_slice %95 {offsets = [3, 0], sizes = [1, 256], strides = [1, 1]} : vector<4x256xf32> to vector<1x256xf32>
    %123 = vector.broadcast %121 : vector<4x1xf32> to vector<4x256xf32>
    %124 = vector.broadcast %122 : vector<1x256xf32> to vector<4x256xf32>
    %125 = arith.mulf %123, %124 : vector<4x256xf32>
    %126 = arith.addf %119, %125 : vector<4x256xf32>
    %127 = vector.extract_strided_slice %57 {offsets = [4, 0], sizes = [4, 256], strides = [1, 1]} : vector<8x256xf32> to vector<4x256xf32>
    %128 = arith.addf %127, %126 : vector<4x256xf32>
    %c4_69 = arith.constant 4 : index
    %c0_70 = arith.constant 0 : index
    %129 = vector.load %arg5[%c4_69, %c0_70] : memref<8x256xf32, #tpu.memory_space<vmem>>, vector<4x256xf32>
    tpu.vector_store %arg5[%c4_69, %c0_70], %128 {strides = array<i32>} : memref<8x256xf32, #tpu.memory_space<vmem>>, vector<4x256xf32>,
    return
  }
  func.func @transform_0(%arg0: i32) -> (i32, i32, i32) {
    %c0_i32 = arith.constant 0 : i32
    %c0_i32_0 = arith.constant 0 : i32
    %c0_i32_1 = arith.constant 0 : i32
    return %arg0, %c0_i32, %c0_i32_0 : i32, i32, i32
  }
  func.func @transform_1(%arg0: i32) -> (i32, i32, i32, i32) {
    %c0_i32 = arith.constant 0 : i32
    %c0_i32_0 = arith.constant 0 : i32
    %c0_i32_1 = arith.constant 0 : i32
    %c0_i32_2 = arith.constant 0 : i32
    %c0_i32_3 = arith.constant 0 : i32
    return %c0_i32, %c0_i32_0, %c0_i32_1, %c0_i32_2 : i32, i32, i32, i32
  }
  func.func @transform_2(%arg0: i32) -> (i32, i32) {
    %c0_i32 = arith.constant 0 : i32
    %c0_i32_0 = arith.constant 0 : i32
    %c0_i32_1 = arith.constant 0 : i32
    return %c0_i32, %c0_i32_0 : i32, i32
  }
  func.func @transform_3(%arg0: i32) -> (i32, i32, i32) {
    %c0_i32 = arith.constant 0 : i32
    %c0_i32_0 = arith.constant 0 : i32
    %c0_i32_1 = arith.constant 0 : i32
    %c0_i32_2 = arith.constant 0 : i32
    return %c0_i32, %c0_i32_0, %c0_i32_1 : i32, i32, i32
  }
  func.func @transform_4(%arg0: i32) -> (i32, i32) {
    %c0_i32 = arith.constant 0 : i32
    %c0_i32_0 = arith.constant 0 : i32
    return %arg0, %c0_i32 : i32, i32
  }
}

</mosaic_0001>

<bundles_post_ra>
// kernel: tpu_custom_call.1
= control target key start
LH: loop header
LB: loop body
LE: loop exit
PB: predicated region body
PF: predicated region fallthrough
CT: control target
= control target key end

     0   :  { %9 = vsyncpa [#allocation4], 0  ;;  %s2096_s0 = inlined_call_operand.vmem [shape: f32[2,12,256], index: 0, kind: input, shape index: {}]   ;;  %s2097_s1 = inlined_call_operand.vmem [shape: bf16[2,4,4,256], index: 1, kind: input, shape index: {}]   ;;  %s2098_s2 = inlined_call_operand.hbm [shape: bf16[512,256], index: 2, kind: input, shape index: {}]   ;;  %s2099_s3 = inlined_call_operand.vmem [shape: f32[5,4,1], index: 3, kind: input, shape index: {}]   ;;  %s2100_s4 = inlined_call_operand.hbm [shape: f32[8,256], index: 4, kind: output, shape index: {}]  }
   0x1   :  { %10 = vsyncpa [#allocation5], 0  ;;  %s19_s17 = sshll.u32 %s2098_s2, 4  ;;  %s1601_s18 = smov [#allocation3]   ;;  %s20_s17 = int_to_ptr.hbm [resolvable:$true] %s19_s17 }
   0x2   :  { %s21_s19 = sshll.u32 %s1601_s18, 4  ;;  %s1602_s20 = smov 128   ;;  %s22_s19 = int_to_ptr.vmem [resolvable:$true] %s21_s19 }
   0x3   :  { %s1603_s21 = smov 8  }
   0x4   :  { %27 = dma.hbm_to_vmem [thread:$0]  %s20_s17, 8192, %s22_s19, [#allocation4], %s1602_s20, %s1602_s20, %s1603_s21  }
   0x5   :  { %1597 = dma.done.wait [#allocation4], 8192  }
   0x6   :  { %1598 = vsyncadd [#allocation4], 4294959104  ;;  %v1250_v0 = vld [vmem:[#allocation3 + $0x70] sm:$0xf]  ;;  %v1473_v1 = vld [vmem:[#allocation3 + $0x74] sm:$0xf0] }
   0x7   :  { %v1314_v2 = vld [vmem:[#allocation3 + $0xf0] sm:$0xf]  ;;  %v1251_v3 = vor.u32 %v1473_v1, %v1250_v0  ;;  %v1489_v4 = vld [vmem:[#allocation3 + $0xf4] sm:$0xf0]  ;;  %v1242_v5 = vld [vmem:[#allocation3 + $0x60] sm:$0xf] }
   0x8   :  { %v1471_v6 = vld [vmem:[#allocation3 + $0x64] sm:$0xf0]  ;;  %v1315_v7 = vor.u32 %v1489_v4, %v1314_v2  ;;  %v1306_v8 = vld [vmem:[#allocation3 + $0xe0] sm:$0xf]  ;;  %v1378_v10 = vld [vmem:[#allocation3 + $0x170] sm:$0xf] }
   0x9   :  { %v1487_v9 = vld [vmem:[#allocation3 + $0xe4] sm:$0xf0]  ;;  %933 = vmatpush.bf16.msra.mxu0 %v1251_v3  ;;  %v1243_v11 = vor.u32 %v1471_v6, %v1242_v5  ;;  %v1505_v12 = vld [vmem:[#allocation3 + $0x174] sm:$0xf0]  ;;  %v1442_v13 = vld [vmem:[#allocation3 + $0x1f0] sm:$0xf] }
   0xa   :  { %v1521_v14 = vld [vmem:[#allocation3 + $0x1f4] sm:$0xf0]  ;;  %946 = vmatpush.bf16.msra.mxu1 %v1315_v7  ;;  %v1307_v15 = vor.u32 %v1487_v9, %v1306_v8  ;;  %v1379_v16 = vor.u32 %v1505_v12, %v1378_v10  ;;  %v1234_v18 = vld [vmem:[#allocation3 + $0x50] sm:$0xf]  ;;  %v1370_v22 = vld [vmem:[#allocation3 + $0x160] sm:$0xf] }
   0xb   :  { %v1443_v17 = vor.u32 %v1521_v14, %v1442_v13  ;;  %v1469_v19 = vld [vmem:[#allocation3 + $0x54] sm:$0xf0]  ;;  %v1298_v20 = vld [vmem:[#allocation3 + $0xd0] sm:$0xf]  ;;  %v1503_v23 = vld [vmem:[#allocation3 + $0x164] sm:$0xf0] }
   0xc   :  { %v1485_v21 = vld [vmem:[#allocation3 + $0xd4] sm:$0xf0]  ;;  %959 = vmatpush.bf16.msra.mxu2 %v1379_v16  ;;  %v1371_v24 = vor.u32 %v1503_v23, %v1370_v22  ;;  %v1434_v25 = vld [vmem:[#allocation3 + $0x1e0] sm:$0xf]  ;;  %v1519_v26 = vld [vmem:[#allocation3 + $0x1e4] sm:$0xf0]  ;;  %v1235_v27 = vor.u32 %v1469_v19, %v1234_v18 }
   0xd   :  { %972 = vmatpush.bf16.msra.mxu3 %v1443_v17  ;;  %934 = vmatpush.bf16.msra.mxu0 %v1243_v11  ;;  %v1435_v28 = vor.u32 %v1519_v26, %v1434_v25  ;;  %v1226_v29 = vld [vmem:[#allocation3 + $0x40] sm:$0xf]  ;;  %v1467_v30 = vld [vmem:[#allocation3 + $0x44] sm:$0xf0]  ;;  %v1299_v31 = vor.u32 %v1485_v21, %v1298_v20  ;;  %v1362_v32 = vld [vmem:[#allocation3 + $0x150] sm:$0xf] }
   0xe   :  { %947 = vmatpush.bf16.msra.mxu1 %v1307_v15  ;;  %v1501_v33 = vld [vmem:[#allocation3 + $0x154] sm:$0xf0]  ;;  %v1426_v34 = vld [vmem:[#allocation3 + $0x1d0] sm:$0xf]  ;;  %v1290_v35 = vld [vmem:[#allocation3 + $0xc0] sm:$0xf]  ;;  %v1227_v41 = vor.u32 %v1467_v30, %v1226_v29 }
   0xf   :  { %v1483_v36 = vld [vmem:[#allocation3 + $0xc4] sm:$0xf0]  ;;  %v1517_v37 = vld [vmem:[#allocation3 + $0x1d4] sm:$0xf0]  ;;  %v1363_v38 = vor.u32 %v1501_v33, %v1362_v32  ;;  %v1354_v40 = vld [vmem:[#allocation3 + $0x140] sm:$0xf] }
  0x10   :  { %960 = vmatpush.bf16.msra.mxu2 %v1371_v24  ;;  %v1427_v39 = vor.u32 %v1517_v37, %v1426_v34  ;;  %v1499_v42 = vld [vmem:[#allocation3 + $0x144] sm:$0xf0]  ;;  %v1418_v43 = vld [vmem:[#allocation3 + $0x1c0] sm:$0xf]  ;;  %v1291_v45 = vor.u32 %v1483_v36, %v1290_v35  ;;  %v1218_v46 = vld [vmem:[#allocation3 + $0x30] sm:$0xf] }
  0x11   :  { %973 = vmatpush.bf16.msra.mxu3 %v1435_v28  ;;  %935 = vmatpush.bf16.msra.mxu0 %v1235_v27  ;;  %v1515_v44 = vld [vmem:[#allocation3 + $0x1c4] sm:$0xf0]  ;;  %v1465_v47 = vld [vmem:[#allocation3 + $0x34] sm:$0xf0]  ;;  %v1282_v48 = vld [vmem:[#allocation3 + $0xb0] sm:$0xf]  ;;  %v1355_v50 = vor.u32 %v1499_v42, %v1354_v40 }
  0x12   :  { %948 = vmatpush.bf16.msra.mxu1 %v1299_v31  ;;  %v1481_v49 = vld [vmem:[#allocation3 + $0xb4] sm:$0xf0]  ;;  %v1419_v51 = vor.u32 %v1515_v44, %v1418_v43  ;;  %v1346_v52 = vld [vmem:[#allocation3 + $0x130] sm:$0xf]  ;;  %v1219_v53 = vor.u32 %v1465_v47, %v1218_v46  ;;  %v1210_v58 = vld [vmem:[#allocation3 + $0x20] sm:$0xf] }
  0x13   :  { %v1497_v54 = vld [vmem:[#allocation3 + $0x134] sm:$0xf0]  ;;  %v1410_v55 = vld [vmem:[#allocation3 + $0x1b0] sm:$0xf]  ;;  %v1283_v57 = vor.u32 %v1481_v49, %v1282_v48  ;;  %v1463_v59 = vld [vmem:[#allocation3 + $0x24] sm:$0xf0] }
  0x14   :  { %961 = vmatpush.bf16.msra.mxu2 %v1363_v38  ;;  %v1513_v56 = vld [vmem:[#allocation3 + $0x1b4] sm:$0xf0]  ;;  %v1274_v60 = vld [vmem:[#allocation3 + $0xa0] sm:$0xf]  ;;  %v1479_v61 = vld [vmem:[#allocation3 + $0xa4] sm:$0xf0]  ;;  %v1347_v62 = vor.u32 %v1497_v54, %v1346_v52  ;;  %v1211_v1 = vor.u32 %v1463_v59, %v1210_v58 }
  0x15   :  { %974 = vmatpush.bf16.msra.mxu3 %v1427_v39  ;;  %936 = vmatpush.bf16.msra.mxu0 %v1227_v41  ;;  %v1411_v63 = vor.u32 %v1513_v56, %v1410_v55  ;;  %v1338_v0 = vld [vmem:[#allocation3 + $0x120] sm:$0xf]  ;;  %v1495_v2 = vld [vmem:[#allocation3 + $0x124] sm:$0xf0]  ;;  %v1275_v5 = vor.u32 %v1479_v61, %v1274_v60  ;;  %v1202_v6 = vld [vmem:[#allocation3 + $0x10] sm:$0xf] }
  0x16   :  { %949 = vmatpush.bf16.msra.mxu1 %v1291_v45  ;;  %v1402_v3 = vld [vmem:[#allocation3 + $0x1a0] sm:$0xf]  ;;  %v1511_v4 = vld [vmem:[#allocation3 + $0x1a4] sm:$0xf0]  ;;  %v1461_v7 = vld [vmem:[#allocation3 + $0x14] sm:$0xf0]  ;;  %v1339_v10 = vor.u32 %v1495_v2, %v1338_v0 }
  0x17   :  { %v1266_v8 = vld [vmem:[#allocation3 + $0x90] sm:$0xf]  ;;  %v1477_v9 = vld [vmem:[#allocation3 + $0x94] sm:$0xf0]  ;;  %v1403_v11 = vor.u32 %v1511_v4, %v1402_v3  ;;  %v1194_v12 = vld [vmem:[#allocation3] sm:$0xf]  ;;  %v1203_v16 = vor.u32 %v1461_v7, %v1202_v6 }
  0x18   :  { %962 = vmatpush.bf16.msra.mxu2 %v1355_v50  ;;  %v1459_v13 = vld [vmem:[#allocation3 + $0x4] sm:$0xf0]  ;;  %v1330_v14 = vld [vmem:[#allocation3 + $0x110] sm:$0xf]  ;;  %v1493_v15 = vld [vmem:[#allocation3 + $0x114] sm:$0xf0]  ;;  %v1267_v22 = vor.u32 %v1477_v9, %v1266_v8 }
  0x19   :  { %975 = vmatpush.bf16.msra.mxu3 %v1419_v51  ;;  %937 = vmatpush.bf16.msra.mxu0 %v1219_v53  ;;  %v1258_v17 = vld [vmem:[#allocation3 + $0x80] sm:$0xf]  ;;  %v1394_v18 = vld [vmem:[#allocation3 + $0x190] sm:$0xf]  ;;  %v1509_v19 = vld [vmem:[#allocation3 + $0x194] sm:$0xf0]  ;;  %v1331_v29 = vor.u32 %v1493_v15, %v1330_v14  ;;  %v1195_v34 = vor.u32 %v1459_v13, %v1194_v12 }
  0x1a   :  { %950 = vmatpush.bf16.msra.mxu1 %v1283_v57  ;;  %v1604_v20 = vmov 0   ;;  %v1104_v21 = vld [vmem:[%s2099_s3] sm:$0xf]  ;;  %v1475_v23 = vld [vmem:[#allocation3 + $0x84] sm:$0xf0]  ;;  %v1395_v30 = vor.u32 %v1509_v19, %v1394_v18  ;;  %v1538_v60 = vld [vmem:[%s2097_s1 + $0x8] sm:$0xff]  }
  0x1b   :  { %1546 = vset.pattern.permute.xlu0 %v1604_v20  ;;  %v1472_v24 = vld [vmem:[#allocation3 + $0x74] sm:$0xf]  ;;  %v1252_v25 = vld [vmem:[#allocation3 + $0x78] sm:$0xf0]  ;;  %v1322_v28 = vld [vmem:[#allocation3 + $0x100] sm:$0xf]  ;;  %1547 = vset.pattern.permute.xlu1 %v1604_v20  ;;  %v1259_v38 = vor.u32 %v1475_v23, %v1258_v17  ;;  %v1653_v0 = vunpack.c.l.bf16 %v1538_v60  ;;  %v1655_v3 = vunpack.c.h.bf16 %v1538_v60 }
  0x1c   :  { %963 = vmatpush.bf16.msra.mxu2 %v1347_v62  ;;  %1107 = vperm.xlu0 %1546, %v1104_v21   ;;  %v1488_v26 = vld [vmem:[#allocation3 + $0xf4] sm:$0xf]  ;;  %v1316_v27 = vld [vmem:[#allocation3 + $0xf8] sm:$0xf0]  ;;  %v1491_v31 = vld [vmem:[#allocation3 + $0x104] sm:$0xf0]  ;;  %v1255_v39 = vor.u32 %v1472_v24, %v1252_v25 }
  0x1d   :  { %976 = vmatpush.bf16.msra.mxu3 %v1411_v63  ;;  %938 = vmatpush.bf16.msra.mxu0 %v1211_v1  ;;  %v1386_v32 = vld [vmem:[#allocation3 + $0x180] sm:$0xf]  ;;  %v1523_v33 = vld [vmem:[%s2097_s1] sm:$0xff]   ;;  %v1507_v35 = vld [vmem:[#allocation3 + $0x184] sm:$0xf0]  ;;  %v1319_v43 = vor.u32 %v1488_v26, %v1316_v27  ;;  %v1323_v46 = vor.u32 %v1491_v31, %v1322_v28  ;;  %2122 = vst [vmem:[#allocation11_spill] sm:$0xff] %v1653_v0 }
  0x1e   :  { %951 = vmatpush.bf16.msra.mxu1 %v1275_v5  ;;  %1548 = vset.pattern.permute.xlu2 %v1604_v20  ;;  %v1504_v36 = vld [vmem:[#allocation3 + $0x174] sm:$0xf]  ;;  %v1380_v37 = vld [vmem:[#allocation3 + $0x178] sm:$0xf0]  ;;  %v1454_v42 = vld [vmem:[%s2099_s3 + $0x10] sm:$0xf]  ;;  %v1387_v47 = vor.u32 %v1507_v35, %v1386_v32  ;;  %v1646_v51 = vunpack.c.l.bf16 %v1523_v33  ;;  %v1648_v56 = vunpack.c.h.bf16 %v1523_v33 }
  0x1f   :  { %v1520_v40 = vld [vmem:[#allocation3 + $0x1f4] sm:$0xf]  ;;  %v1444_v41 = vld [vmem:[#allocation3 + $0x1f8] sm:$0xf0]  ;;  %v1470_v44 = vld [vmem:[#allocation3 + $0x64] sm:$0xf]  ;;  %1116 = vperm.xlu1 %1547, %v1454_v42   ;;  %v1383_v52 = vor.u32 %v1504_v36, %v1380_v37 }
  0x20   :  { %964 = vmatpush.bf16.msra.mxu2 %v1339_v10  ;;  %v1244_v45 = vld [vmem:[#allocation3 + $0x68] sm:$0xf0]  ;;  %v1486_v48 = vld [vmem:[#allocation3 + $0xe4] sm:$0xf]  ;;  %v1041_v50 = vld [vmem:[%s2099_s3] sm:$0xf]  ;;  %v1447_v53 = vor.u32 %v1520_v40, %v1444_v41 }
  0x21   :  { %977 = vmatpush.bf16.msra.mxu3 %v1403_v11  ;;  %939 = vmatpush.bf16.msra.mxu0 %v1203_v16  ;;  %v1308_v49 = vld [vmem:[#allocation3 + $0xe8] sm:$0xf0]  ;;  %2120 = vst [vmem:[#allocation9_spill] sm:$0xff] %v1646_v51  ;;  %v1502_v54 = vld [vmem:[#allocation3 + $0x164] sm:$0xf]  ;;  %v1247_v57 = vor.u32 %v1470_v44, %v1244_v45  ;;  %vm58_vm0 = vcmask 1040384  }
  0x22   :  { %952 = vmatpush.bf16.msra.mxu1 %v1267_v22  ;;  %v1372_v55 = vld [vmem:[#allocation3 + $0x168] sm:$0xf0]  ;;  %2121 = vst [vmem:[#allocation10_spill] sm:$0xff] %v1648_v56  ;;  %v1518_v58 = vld [vmem:[#allocation3 + $0x1e4] sm:$0xf]  ;;  %v1311_v61 = vor.u32 %v1486_v48, %v1308_v49  ;;  %vm60_vm1 = vcmask 1041409  }
  0x23   :  { %v1436_v59 = vld [vmem:[#allocation3 + $0x1e8] sm:$0xf0]  ;;  %v1468_v62 = vld [vmem:[#allocation3 + $0x54] sm:$0xf]  ;;  %v1236_v63 = vld [vmem:[#allocation3 + $0x58] sm:$0xf0]  ;;  %v1375_v4 = vor.u32 %v1502_v54, %v1372_v55 }
  0x24   :  { %965 = vmatpush.bf16.msra.mxu2 %v1331_v29  ;;  %1044 = vperm.xlu0 %1546, %v1041_v50   ;;  %v1484_v1 = vld [vmem:[#allocation3 + $0xd4] sm:$0xf]  ;;  %v1300_v2 = vld [vmem:[#allocation3 + $0xd8] sm:$0xf0]  ;;  %2123 = vst [vmem:[#allocation12_spill] sm:$0xff] %v1655_v3  ;;  %v1439_v5 = vor.u32 %v1518_v58, %v1436_v59  ;;  %v1239_v7 = vor.u32 %v1468_v62, %v1236_v63  ;;  %v1539_v27 = vld [vmem:[%s2097_s1 + $0x10] sm:$0xff]  }
  0x25   :  { %978 = vmatpush.bf16.msra.mxu3 %v1395_v30  ;;  %940 = vmatpush.bf16.msra.mxu0 %v1195_v34  ;;  %89 = vst [vmem:[#allocation1] ss:$2 sm:$0xff] %v1646_v51  ;;  %v1500_v6 = vld [vmem:[#allocation3 + $0x154] sm:$0xf]  ;;  %v1364_v8 = vld [vmem:[#allocation3 + $0x158] sm:$0xf0]  ;;  %v1303_v11 = vor.u32 %v1484_v1, %v1300_v2  ;;  %v1681_v30 = vunpack.c.l.bf16 %v1539_v27  ;;  %v1688_v33 = vunpack.c.h.bf16 %v1539_v27 }
  0x26   :  { %953 = vmatpush.bf16.msra.mxu1 %v1259_v38  ;;  %93 = vst [vmem:[#allocation1 + $0x10] ss:$2 sm:$0xff] %v1648_v56  ;;  %v1516_v9 = vld [vmem:[#allocation3 + $0x1d4] sm:$0xf]  ;;  %v1428_v10 = vld [vmem:[#allocation3 + $0x1d8] sm:$0xf0]  ;;  %v1367_v16 = vor.u32 %v1500_v6, %v1364_v8 }
  0x27   :  { %v1466_v12 = vld [vmem:[#allocation3 + $0x44] sm:$0xf]  ;;  %v1228_v13 = vld [vmem:[#allocation3 + $0x48] sm:$0xf0]  ;;  %97 = vst [vmem:[#allocation1 + $0x20] ss:$2 sm:$0xff] %v1653_v0  ;;  %v1431_v17 = vor.u32 %v1516_v9, %v1428_v10 }
  0x28   :  { %966 = vmatpush.bf16.msra.mxu2 %v1323_v46  ;;  %v1482_v14 = vld [vmem:[#allocation3 + $0xc4] sm:$0xf]  ;;  %v1292_v15 = vld [vmem:[#allocation3 + $0xc8] sm:$0xf0]  ;;  %101 = vst [vmem:[#allocation1 + $0x30] ss:$2 sm:$0xff] %v1655_v3  ;;  %v1231_v18 = vor.u32 %v1466_v12, %v1228_v13 }
  0x29   :  { %985 = vmatpush.bf16.msrb.mxu0 %v1255_v39  ;;  %979 = vmatpush.bf16.msra.mxu3 %v1387_v47  ;;  %v53_v19 = vld [vmem:[%s2096_s0] sm:$0xf0]  ;;  %v1295_v20 = vor.u32 %v1482_v14, %v1292_v15  ;;  %v54_v23 = vld [vmem:[%s2096_s0 + $0x8] sm:$0xf0]  ;;  %v52_v25 = vld [vmem:[%s2096_s0 + $0x8] sm:$0xf] }
  0x2a   :  { %998 = vmatpush.bf16.msrb.mxu1 %v1319_v43  ;;  %v57_v26 = vrot.slane %v52_v25, 7  ;;  %v51_v28 = vld [vmem:[%s2096_s0] sm:$0xf]  ;;  %v1540_v29 = vld [vmem:[%s2097_s1 + $0x18] sm:$0xff]   ;;  %vm63_vm2 = vcmask 1042434   ;;  %vm66_vm3 = vcmask 1043459  }
  0x2b   :  { %v1695_v37 = vunpack.c.l.bf16 %v1540_v29  ;;  %v1703_v41 = vunpack.c.h.bf16 %v1540_v29  ;;  %vm191_vm4 = vcmask 1043456   ;;  %s1174_s20 = sshll.u32 %s2100_s4, 4  ;;  %s1175_s20 = int_to_ptr.hbm [resolvable:$true] %s1174_s20 }
  0x2c   :  { %1011 = vmatpush.bf16.msrb.mxu2 %v1383_v52  ;;  %v90_v21 = vld.sshfl [vmem:[#allocation1] sm:$0xff pattern:$0x75316420]  ;;  %v1664_v22 = vld.sshfl [vmem:[#allocation1 + $0x8] sm:$0xff pattern:$0x75316420]  ;;  %v1684_v31 = vsel %vm60_vm1, %v51_v28, %v57_v26  ;;  %v1691_v34 = vsel %vm63_vm2, %v51_v28, %v57_v26  ;;  %v1706_v42 = vsel %vm58_vm0, %v51_v28, %v57_v26  ;;  %v1710_v44 = vsel %vm66_vm3, %v51_v28, %v57_v26 }
  0x2d   :  { %1024 = vmatpush.bf16.msrb.mxu3 %v1447_v53  ;;  %986 = vmatpush.bf16.msrb.mxu0 %v1247_v57  ;;  %v94_v24 = vld.sshfl [vmem:[#allocation1 + $0x10] sm:$0xff pattern:$0x75316420]  ;;  %122 = vst [vmem:[#allocation1] sm:$0xff] %v53_v19  ;;  %v62_v43 = vrot.slane %v1684_v31, 1  ;;  %v65_v47 = vrot.slane %v1691_v34, 2 }
  0x2e   :  { %999 = vmatpush.bf16.msrb.mxu1 %v1311_v61  ;;  %123 = vst [vmem:[#allocation1 + $0x9] sm:$0xff] %v54_v23  ;;  %v1686_v32 = vld.sshfl [vmem:[#allocation1 + $0x18] sm:$0xff pattern:$0x75316420]  ;;  %v2106_v49 = vrot.slane %v1710_v44, 3  ;;  %v2105_v50 = vperm.slane %v1706_v42, 0 }
  0x2f   :  { %v98_v35 = vld.sshfl [vmem:[#allocation1 + $0x20] sm:$0xff pattern:$0x75316420]  ;;  %v1693_v36 = vld.sshfl [vmem:[#allocation1 + $0x28] sm:$0xff pattern:$0x75316420] }
  0x30   :  { %1012 = vmatpush.bf16.msrb.mxu2 %v1375_v4  ;;  %v102_v45 = vld.sshfl [vmem:[#allocation1 + $0x30] sm:$0xff pattern:$0x75316420]  ;;  %v1715_v48 = vld.sshfl [vmem:[#allocation1 + $0x38] sm:$0xff pattern:$0x75316420]  ;;  %v112_v58 = vmul.f32 %v90_v21, %v2105_v50 }
  0x31   :  { %1025 = vmatpush.bf16.msrb.mxu3 %v1439_v5  ;;  %987 = vmatpush.bf16.msrb.mxu0 %v1239_v7  ;;  %v1724_v52 = vperm.slane %v62_v43, 0  ;;  %v1729_v53 = vperm.slane %v65_v47, 0  ;;  %v1735_v57 = vperm.slane %v2106_v49, 0  ;;  %v1832_v50 = vperm.slane %v62_v43, 1 }
  0x32   :  { %1000 = vmatpush.bf16.msrb.mxu1 %v1303_v11 }
  0x33   :  { %v114_v60 = vmul.f32 %v94_v24, %v1724_v52  ;;  %v116_v63 = vmul.f32 %v98_v35, %v1729_v53  ;;  %v118_v8 = vmul.f32 %v102_v45, %v1735_v57  ;;  %v115_v43 = vmul.f32 %v1686_v32, %v1832_v50 }
  0x34   :  { %1013 = vmatpush.bf16.msrb.mxu2 %v1367_v16 }
  0x35   :  { %1026 = vmatpush.bf16.msrb.mxu3 %v1431_v17  ;;  %988 = vmatpush.bf16.msrb.mxu0 %v1231_v18  ;;  %v1697_v38 = vld [vmem:[#allocation1 + $0x4] ss:$9 sm:$0xff]  ;;  %v1701_v40 = vld [vmem:[#allocation1 + $0x6] ss:$9 sm:$0xff] }
  0x36   :  { %1001 = vmatpush.bf16.msrb.mxu1 %v1295_v20  ;;  %v1699_v39 = vld [vmem:[#allocation1 + $0x5] ss:$9 sm:$0xff]  ;;  %v1712_v46 = vld [vmem:[#allocation1 + $0x7] ss:$9 sm:$0xff]  ;;  %v2104_v54 = vperm.slane %v1697_v38, 0  ;;  %v2102_v59 = vperm.slane %v1701_v40, 0 }
  0x37   :  { %152 = vst [vmem:[#allocation1] ss:$2 sm:$0xff] %v1681_v30  ;;  %v2103_v55 = vperm.slane %v1699_v39, 0  ;;  %v2101_v61 = vperm.slane %v1712_v46, 0 }
  0x38   :  { %156 = vst [vmem:[#allocation1 + $0x10] ss:$2 sm:$0xff] %v1688_v33 }
  0x39   :  { %160 = vst [vmem:[#allocation1 + $0x20] ss:$2 sm:$0xff] %v1695_v37 }
  0x3a   :  { %164 = vst [vmem:[#allocation1 + $0x30] ss:$2 sm:$0xff] %v1703_v41 }
  0x3e   :  { %v153_v62 = vld.sshfl [vmem:[#allocation1] sm:$0xff pattern:$0x75316420]  ;;  %v1743_v1 = vld.sshfl [vmem:[#allocation1 + $0x8] sm:$0xff pattern:$0x75316420] }
  0x3f   :  { %v157_v2 = vld.sshfl [vmem:[#allocation1 + $0x10] sm:$0xff pattern:$0x75316420]  ;;  %v175_v4 = vmul.f32 %v153_v62, %v2104_v54  ;;  %v1747_v5 = vld.sshfl [vmem:[#allocation1 + $0x18] sm:$0xff pattern:$0x75316420] }
  0x40   :  { %v161_v6 = vld.sshfl [vmem:[#allocation1 + $0x20] sm:$0xff pattern:$0x75316420]  ;;  %v177_v7 = vmul.f32 %v157_v2, %v2103_v55  ;;  %v1752_v9 = vld.sshfl [vmem:[#allocation1 + $0x28] sm:$0xff pattern:$0x75316420] }
  0x41   :  { %v165_v10 = vld.sshfl [vmem:[#allocation1 + $0x30] sm:$0xff pattern:$0x75316420]  ;;  %v179_v11 = vmul.f32 %v161_v6, %v2102_v59  ;;  %v183_v12 = vsub.f32 %v112_v58, %v175_v4  ;;  %v1756_v13 = vld.sshfl [vmem:[#allocation1 + $0x38] sm:$0xff pattern:$0x75316420] }
  0x42   :  { %v181_v14 = vmul.f32 %v165_v10, %v2101_v61  ;;  %v185_v15 = vsub.f32 %v114_v60, %v177_v7  ;;  %206 = vst [vmem:[#allocation1] ss:$2 sm:$0xff] %v1681_v30  ;;  %v2107_v54 = vperm.slane %v1706_v42, 1 }
  0x43   :  { %v187_v16 = vsub.f32 %v116_v63, %v179_v11  ;;  %v192_v17 = vsel %vm191_vm4, %v183_v12, 0.0  ;;  %210 = vst [vmem:[#allocation1 + $0x10] ss:$2 sm:$0xff] %v1688_v33  ;;  %v1189_v63 = vld [vmem:[%s2096_s0 + $0x28] sm:$0xf] }
  0x44   :  { %v193_v18 = vsel %vm191_vm4, %v185_v15, 0.0  ;;  %214 = vst [vmem:[#allocation1 + $0x20] ss:$2 sm:$0xff] %v1695_v37  ;;  %v189_v19 = vsub.f32 %v118_v8, %v181_v14  ;;  %v303_v12 = vrot.slane %v1189_v63, 7  ;;  %v1188_v14 = vld [vmem:[%s2096_s0 + $0x20] sm:$0xf]  ;;  %v113_v31 = vmul.f32 %v1664_v22, %v2107_v54 }
  0x45   :  { %v194_v20 = vadd.f32 %v193_v18, %v192_v17  ;;  %218 = vst [vmem:[#allocation1 + $0x30] ss:$2 sm:$0xff] %v1703_v41  ;;  %v195_v21 = vsel %vm191_vm4, %v187_v16, 0.0  ;;  %v1190_v18 = vld [vmem:[%s2096_s0 + $0x20] sm:$0xf0]  ;;  %v2128_v22 = vrot.slane %v1710_v44, 3 }
  0x46   :  { %v197_v24 = vsel %vm191_vm4, %v189_v19, 0.0  ;;  %v305_v15 = vsel %vm60_vm1, %v1188_v14, %v303_v12  ;;  %v307_v16 = vsel %vm63_vm2, %v1188_v14, %v303_v12  ;;  %v309_v17 = vsel %vm66_vm3, %v1188_v14, %v303_v12  ;;  %v1191_v19 = vld [vmem:[%s2096_s0 + $0x28] sm:$0xf0] }
  0x47   :  { %v196_v23 = vadd.f32 %v195_v21, %v194_v20  ;;  %v306_v20 = vrot.slane %v305_v15, 1  ;;  %v1824_v21 = vsel %vm58_vm0, %v1188_v14, %v303_v12  ;;  %v2108_v12 = vperm.slane %v1697_v38, 1 }
  0x48   :  { %2124 = vst [vmem:[#allocation13_spill] sm:$0xff] %v1824_v21  ;;  %v2110_v14 = vperm.slane %v1699_v39, 1  ;;  %v1865_v54 = vperm.slane %v2128_v22, 1 }
  0x49   :  { %v1768_v25 = vld.sshfl [vmem:[#allocation1] sm:$0xff pattern:$0x75316420]  ;;  %v1770_v26 = vld.sshfl [vmem:[#allocation1 + $0x8] sm:$0xff pattern:$0x75316420]  ;;  %v198_v58 = vadd.f32 %v197_v24, %v196_v23  ;;  %v176_v49 = vmul.f32 %v1743_v1, %v2108_v12 }
  0x4a   :  { %v1772_v27 = vld.sshfl [vmem:[#allocation1 + $0x10] sm:$0xff pattern:$0x75316420]  ;;  %v1774_v28 = vld.sshfl [vmem:[#allocation1 + $0x18] sm:$0xff pattern:$0x75316420] }
  0x4b   :  { %v1776_v29 = vld.sshfl [vmem:[#allocation1 + $0x20] sm:$0xff pattern:$0x75316420]  ;;  %v1778_v35 = vld.sshfl [vmem:[#allocation1 + $0x28] sm:$0xff pattern:$0x75316420] }
  0x4c   :  { %v1780_v45 = vld.sshfl [vmem:[#allocation1 + $0x30] sm:$0xff pattern:$0x75316420]  ;;  %v1782_v60 = vld.sshfl [vmem:[#allocation1 + $0x38] sm:$0xff pattern:$0x75316420] }
  0x4d   :  { %237 = vst [vmem:[#allocation1] ss:$2 sm:$0xff] %v1646_v51  ;;  %v308_v23 = vrot.slane %v307_v16, 2  ;;  %v310_v24 = vrot.slane %v309_v17, 3  ;;  %v1827_v55 = vperm.slane %v306_v20, 0  ;;  %v1841_v59 = vperm.slane %v306_v20, 1 }
  0x4e   :  { %241 = vst [vmem:[#allocation1 + $0x10] ss:$2 sm:$0xff] %v1648_v56  ;;  %v178_v20 = vmul.f32 %v1747_v5, %v2110_v14  ;;  %v2129_v1 = vperm.slane %v1701_v40, 1  ;;  %v184_v14 = vsub.f32 %v113_v31, %v176_v49 }
  0x4f   :  { %245 = vst [vmem:[#allocation1 + $0x20] ss:$2 sm:$0xff] %v1653_v0  ;;  %v1836_v15 = vperm.slane %v308_v23, 0  ;;  %v1838_v16 = vperm.slane %v310_v24, 0  ;;  %v1859_v34 = vperm.slane %v308_v23, 1  ;;  %v2130_v23 = vperm.slane %v1824_v21, 0 }
  0x50   :  { %249 = vst [vmem:[#allocation1 + $0x30] ss:$2 sm:$0xff] %v1655_v3  ;;  %v180_v12 = vmul.f32 %v1752_v9, %v2129_v1 }
  0x51   :  { %290 = vst [vmem:[#allocation2 + $0x10] sm:$0xf] %v198_v58 }
  0x52   :  { %2125 = vst [vmem:[#allocation14_spill] sm:$0xff] %v1827_v55 }
  0x53   :  { %2126 = vst [vmem:[#allocation15_spill] sm:$0xff] %v1841_v59 }
  0x54   :  { %v1788_v62 = vld.sshfl [vmem:[#allocation1] sm:$0xff pattern:$0x75316420]  ;;  %v1793_v2 = vld.sshfl [vmem:[#allocation1 + $0x8] sm:$0xff pattern:$0x75316420] }
  0x55   :  { %v1795_v4 = vld.sshfl [vmem:[#allocation1 + $0x10] sm:$0xff pattern:$0x75316420]  ;;  %v1797_v6 = vld.sshfl [vmem:[#allocation1 + $0x18] sm:$0xff pattern:$0x75316420] }
  0x56   :  { %v1799_v7 = vld.sshfl [vmem:[#allocation1 + $0x20] sm:$0xff pattern:$0x75316420]  ;;  %v1801_v8 = vld.sshfl [vmem:[#allocation1 + $0x28] sm:$0xff pattern:$0x75316420] }
  0x57   :  { %v1803_v10 = vld.sshfl [vmem:[#allocation1 + $0x30] sm:$0xff pattern:$0x75316420]  ;;  %v1805_v11 = vld.sshfl [vmem:[#allocation1 + $0x38] sm:$0xff pattern:$0x75316420] }
  0x58   :  { %327 = vst [vmem:[#allocation1] ss:$2 sm:$0xff] %v1646_v51  ;;  %v186_v51 = vsub.f32 %v115_v43, %v178_v20  ;;  %v2131_v43 = vperm.slane %v1824_v21, 1 }
  0x59   :  { %331 = vst [vmem:[#allocation1 + $0x10] ss:$2 sm:$0xff] %v1648_v56 }
  0x5a   :  { %335 = vst [vmem:[#allocation1 + $0x20] ss:$2 sm:$0xff] %v1653_v0 }
  0x5b   :  { %339 = vst [vmem:[#allocation1 + $0x30] ss:$2 sm:$0xff] %v1655_v3 }
  0x5f   :  { %v328_v58 = vld.sshfl [vmem:[#allocation1] sm:$0xff pattern:$0x75316420]  ;;  %v329_v63 = vld.sshfl [vmem:[#allocation1 + $0x8] sm:$0xff pattern:$0x75316420] }
  0x60   :  { %v332_v61 = vld.sshfl [vmem:[#allocation1 + $0x10] sm:$0xff pattern:$0x75316420]  ;;  %360 = vst [vmem:[#allocation1] sm:$0xff] %v1190_v18  ;;  %v1845_v18 = vperm.slane %v65_v47, 1  ;;  %v1861_v47 = vperm.slane %v310_v24, 1  ;;  %v1875_v24 = vmul.f32 %v328_v58, %v2130_v23 }
  0x61   :  { %361 = vst [vmem:[#allocation1 + $0x9] sm:$0xff] %v1191_v19  ;;  %v333_v17 = vld.sshfl [vmem:[#allocation1 + $0x18] sm:$0xff pattern:$0x75316420]  ;;  %v2114_v19 = vperm.slane %v1712_v46, 1  ;;  %v1878_v3 = vmul.f32 %v332_v61, %v1827_v55 }
  0x62   :  { %2127 = vst [vmem:[#allocation16_spill] sm:$0xff] %v1861_v47  ;;  %v117_v32 = vmul.f32 %v1693_v36, %v1845_v18  ;;  %v336_v56 = vld.sshfl [vmem:[#allocation1 + $0x20] sm:$0xff pattern:$0x75316420]  ;;  %v119_v36 = vmul.f32 %v1715_v48, %v1865_v54  ;;  %v1899_v48 = vmul.f32 %v329_v63, %v2131_v43  ;;  %v1902_v20 = vmul.f32 %v333_v17, %v1841_v59  ;;  %v1356_v55 = vld [vmem:[#allocation3 + $0x148] sm:$0xf0] }
  0x63   :  { %v337_v5 = vld.sshfl [vmem:[#allocation1 + $0x28] sm:$0xff pattern:$0x75316420]  ;;  %v340_v44 = vld.sshfl [vmem:[#allocation1 + $0x30] sm:$0xff pattern:$0x75316420]  ;;  %v182_v9 = vmul.f32 %v1756_v13, %v2114_v19  ;;  %v1886_v0 = vmul.f32 %v336_v56, %v1836_v15  ;;  %v231_v19 = vmul.f32 %v1772_v27, %v1724_v52 }
  0x64   :  { %v341_v22 = vld.sshfl [vmem:[#allocation1 + $0x38] sm:$0xff pattern:$0x75316420]  ;;  %v188_v1 = vsub.f32 %v117_v32, %v180_v12  ;;  %v1889_v58 = vmul.f32 %v340_v44, %v1838_v16  ;;  %v1908_v32 = vmul.f32 %v337_v5, %v1859_v34  ;;  %v199_v63 = vsel %vm191_vm4, %v184_v14, 0.0 }
  0x65   :  { %v190_v12 = vsub.f32 %v119_v36, %v182_v9  ;;  %v1911_v23 = vmul.f32 %v341_v22, %v1861_v47  ;;  %v200_v17 = vsel %vm191_vm4, %v186_v51, 0.0  ;;  %v1464_v14 = vld [vmem:[#allocation3 + $0x34] sm:$0xf]  ;;  %v2132_v51 = vperm.slane %v1706_v42, 0 }
  0x66   :  { %v202_v43 = vsel %vm191_vm4, %v188_v1, 0.0  ;;  %v201_v5 = vadd.f32 %v200_v17, %v199_v63  ;;  %v1220_v63 = vld [vmem:[#allocation3 + $0x38] sm:$0xf0]  ;;  %v1480_v17 = vld [vmem:[#allocation3 + $0xb4] sm:$0xf]  ;;  %v235_v9 = vmul.f32 %v1780_v45, %v1735_v57  ;;  %v2133_v44 = vperm.slane %v1697_v38, 0 }
  0x67   :  { %v204_v22 = vsel %vm191_vm4, %v190_v12, 0.0  ;;  %v229_v1 = vmul.f32 %v1768_v25, %v2132_v51  ;;  %v233_v12 = vmul.f32 %v1776_v29, %v1729_v53  ;;  %v1223_v59 = vor.u32 %v1464_v14, %v1220_v63  ;;  %v1284_v25 = vld [vmem:[#allocation3 + $0xb8] sm:$0xf0]  ;;  %v1498_v51 = vld [vmem:[#allocation3 + $0x144] sm:$0xf] }
  0x68   :  { %v1891_v49 = vld [vmem:[#allocation1 + $0x4] ss:$9 sm:$0xff]  ;;  %v1895_v61 = vld [vmem:[#allocation1 + $0x6] ss:$9 sm:$0xff]  ;;  %v203_v36 = vadd.f32 %v202_v43, %v201_v5  ;;  %v260_v56 = vmul.f32 %v1788_v62, %v2133_v44  ;;  %v2134_v52 = vperm.slane %v1699_v39, 0  ;;  %v2135_v43 = vperm.slane %v1701_v40, 0 }
  0x69   :  { %v1893_v31 = vld [vmem:[#allocation1 + $0x5] ss:$9 sm:$0xff]  ;;  %v1904_v13 = vld [vmem:[#allocation1 + $0x7] ss:$9 sm:$0xff]  ;;  %v2136_v53 = vperm.slane %v1712_v46, 0  ;;  %v1287_v45 = vor.u32 %v1480_v17, %v1284_v25  ;;  %v1359_v21 = vor.u32 %v1498_v51, %v1356_v55  ;;  %989 = vmatpush.bf16.msrb.mxu0 %v1223_v59  ;;  %v2137_v17 = vperm.slane %v1891_v49, 0 }
  0x6a   :  { %386 = vst [vmem:[#allocation1] ss:$2 sm:$0xff] %v1681_v30  ;;  %v262_v27 = vmul.f32 %v1795_v4, %v2134_v52  ;;  %v264_v5 = vmul.f32 %v1799_v7, %v2135_v43  ;;  %v205_v29 = vadd.f32 %v204_v22, %v203_v36  ;;  %v1514_v62 = vld [vmem:[#allocation3 + $0x1c4] sm:$0xf]  ;;  %v1420_v44 = vld [vmem:[#allocation3 + $0x1c8] sm:$0xf0]  ;;  %v268_v63 = vadd.f32 %v260_v56, %v229_v1 }
  0x6b   :  { %390 = vst [vmem:[#allocation1 + $0x10] ss:$2 sm:$0xff] %v1688_v33  ;;  %v266_v57 = vmul.f32 %v1803_v10, %v2136_v53  ;;  %v1455_v14 = vld [vmem:[%s2099_s3 + $0x4] sm:$0xf]  ;;  %v375_v4 = vperm.slane %v1895_v61, 1  ;;  %v377_v52 = vperm.slane %v1904_v13, 1  ;;  %v1423_v7 = vor.u32 %v1514_v62, %v1420_v44  ;;  %1002 = vmatpush.bf16.msrb.mxu1 %v1287_v45  ;;  %1014 = vmatpush.bf16.msrb.mxu2 %v1359_v21 }
  0x6c   :  { %394 = vst [vmem:[#allocation1 + $0x20] ss:$2 sm:$0xff] %v1695_v37  ;;  %1124 = vperm.xlu1 %1547, %v1455_v14   ;;  %v270_v43 = vadd.f32 %v262_v27, %v231_v19  ;;  %v272_v55 = vadd.f32 %v264_v5, %v233_v12  ;;  %v276_v36 = vsel %vm191_vm4, %v268_v63, 0.0  ;;  %v2138_v25 = vperm.slane %v1706_v42, 1 }
  0x6d   :  { %398 = vst [vmem:[#allocation1 + $0x30] ss:$2 sm:$0xff] %v1703_v41  ;;  %v274_v10 = vadd.f32 %v266_v57, %v235_v9  ;;  %1027 = vmatpush.bf16.msrb.mxu3 %v1423_v7  ;;  %v232_v19 = vmul.f32 %v1774_v28, %v1832_v50  ;;  %v234_v21 = vmul.f32 %v1778_v35, %v1845_v18  ;;  %v2139_v9 = vperm.slane %v1893_v31, 0 }
  0x6e   :  { %291 = vst [vmem:[#allocation2] sm:$0xf] %v205_v29  ;;  %v230_v59 = vmul.f32 %v1770_v26, %v2138_v25  ;;  %v2140_v5 = vperm.slane %v1891_v49, 1  ;;  %v2141_v53 = vperm.slane %v1697_v38, 1  ;;  %v2142_v26 = vperm.slane %v1699_v39, 1 }
  0x6f   :  { %v2143_v28 = vperm.slane %v1895_v61, 0  ;;  %v2144_v45 = vperm.slane %v1893_v31, 1  ;;  %v2145_v44 = vperm.slane %v1701_v40, 1 }
  0x70   :  { %v261_v42 = vmul.f32 %v1793_v2, %v2141_v53  ;;  %v263_v57 = vmul.f32 %v1797_v6, %v2142_v26  ;;  %v2146_v2 = vperm.slane %v1904_v13, 0 }
  0x71   :  { %v387_v47 = vld.sshfl [vmem:[#allocation1] sm:$0xff pattern:$0x75316420]  ;;  %v388_v1 = vld.sshfl [vmem:[#allocation1 + $0x8] sm:$0xff pattern:$0x75316420]  ;;  %v265_v38 = vmul.f32 %v1801_v8, %v2145_v44 }
  0x72   :  { %v391_v22 = vld.sshfl [vmem:[#allocation1 + $0x10] sm:$0xff pattern:$0x75316420]  ;;  %v409_v56 = vmul.f32 %v387_v47, %v2137_v17  ;;  %v392_v27 = vld.sshfl [vmem:[#allocation1 + $0x18] sm:$0xff pattern:$0x75316420]  ;;  %v410_v47 = vmul.f32 %v388_v1, %v2140_v5  ;;  %v236_v5 = vmul.f32 %v1782_v60, %v1865_v54 }
  0x73   :  { %v395_v12 = vld.sshfl [vmem:[#allocation1 + $0x20] sm:$0xff pattern:$0x75316420]  ;;  %v411_v51 = vmul.f32 %v391_v22, %v2139_v9  ;;  %v396_v29 = vld.sshfl [vmem:[#allocation1 + $0x28] sm:$0xff pattern:$0x75316420]  ;;  %v412_v62 = vmul.f32 %v392_v27, %v2144_v45  ;;  %v273_v44 = vadd.f32 %v265_v38, %v234_v21 }
  0x74   :  { %v399_v50 = vld.sshfl [vmem:[#allocation1 + $0x30] sm:$0xff pattern:$0x75316420]  ;;  %v413_v35 = vmul.f32 %v395_v12, %v2143_v28  ;;  %v417_v18 = vsub.f32 %v1875_v24, %v409_v56  ;;  %v400_v6 = vld.sshfl [vmem:[#allocation1 + $0x38] sm:$0xff pattern:$0x75316420]  ;;  %v414_v63 = vmul.f32 %v396_v29, %v375_v4  ;;  %v418_v7 = vsub.f32 %v1899_v48, %v410_v47 }
  0x75   :  { %v415_v14 = vmul.f32 %v399_v50, %v2146_v2  ;;  %v419_v39 = vsub.f32 %v1878_v3, %v411_v51  ;;  %447 = vst [vmem:[#allocation1 + $0x20] ss:$2 sm:$0xff] %v1695_v37  ;;  %v416_v40 = vmul.f32 %v400_v6, %v377_v52  ;;  %v420_v8 = vsub.f32 %v1902_v20, %v412_v62  ;;  %v2148_v62 = vld [vmem:[#allocation11_spill] sm:$0xff]  ;;  %v2151_v38 = vld [vmem:[#allocation10_spill] sm:$0xff] }
  0x76   :  { %v421_v24 = vsub.f32 %v1886_v0, %v413_v35  ;;  %v425_v22 = vsel %vm191_vm4, %v417_v18, 0.0  ;;  %451 = vst [vmem:[#allocation1 + $0x30] ss:$2 sm:$0xff] %v1703_v41  ;;  %v422_v56 = vsub.f32 %v1908_v32, %v414_v63  ;;  %v432_v48 = vsel %vm191_vm4, %v418_v7, 0.0  ;;  %v2150_v63 = vld [vmem:[#allocation9_spill] sm:$0xff] }
  0x77   :  { %v423_v3 = vsub.f32 %v1889_v58, %v415_v14  ;;  %v426_v17 = vsel %vm191_vm4, %v419_v39, 0.0  ;;  %439 = vst [vmem:[#allocation1] ss:$2 sm:$0xff] %v1681_v30  ;;  %v424_v1 = vsub.f32 %v1911_v23, %v416_v40  ;;  %v433_v25 = vsel %vm191_vm4, %v420_v8, 0.0 }
  0x78   :  { %v427_v0 = vadd.f32 %v426_v17, %v425_v22  ;;  %v428_v37 = vsel %vm191_vm4, %v421_v24, 0.0  ;;  %443 = vst [vmem:[#allocation1 + $0x10] ss:$2 sm:$0xff] %v1688_v33  ;;  %v434_v58 = vadd.f32 %v433_v25, %v432_v48  ;;  %v435_v20 = vsel %vm191_vm4, %v422_v56, 0.0  ;;  %v1462_v24 = vld [vmem:[#allocation3 + $0x24] sm:$0xf] }
  0x79   :  { %v430_v41 = vsel %vm191_vm4, %v423_v3, 0.0  ;;  %v277_v32 = vsel %vm191_vm4, %v270_v43, 0.0  ;;  %v437_v9 = vsel %vm191_vm4, %v424_v1, 0.0  ;;  %v279_v51 = vsel %vm191_vm4, %v272_v55, 0.0  ;;  %v1212_v22 = vld [vmem:[#allocation3 + $0x28] sm:$0xf0] }
  0x7a   :  { %v429_v12 = vadd.f32 %v428_v37, %v427_v0  ;;  %v278_v30 = vadd.f32 %v277_v32, %v276_v36  ;;  %v436_v27 = vadd.f32 %v435_v20, %v434_v58  ;;  %v281_v23 = vsel %vm191_vm4, %v274_v10, 0.0  ;;  %v2154_v20 = vld [vmem:[#allocation16_spill] sm:$0xff] }
  0x7b   :  { %v2147_v33 = vperm.slane %v1712_v46, 1  ;;  %v269_v36 = vadd.f32 %v261_v42, %v230_v59  ;;  %v271_v10 = vadd.f32 %v263_v57, %v232_v19  ;;  %v2149_v46 = vld [vmem:[#allocation12_spill] sm:$0xff]  ;;  %v286_v42 = vsel %vm191_vm4, %v273_v44, 0.0 }
  0x7c   :  { %v431_v53 = vadd.f32 %v430_v41, %v429_v12  ;;  %v449_v26 = vld.sshfl [vmem:[#allocation1 + $0x28] sm:$0xff pattern:$0x75316420]  ;;  %v280_v50 = vadd.f32 %v279_v51, %v278_v30  ;;  %v448_v43 = vld.sshfl [vmem:[#allocation1 + $0x20] sm:$0xff pattern:$0x75316420]  ;;  %v438_v28 = vadd.f32 %v437_v9, %v436_v27  ;;  %v1215_v56 = vor.u32 %v1462_v24, %v1212_v22 }
  0x7d   :  { %v267_v47 = vmul.f32 %v1805_v11, %v2147_v33  ;;  %v453_v35 = vld.sshfl [vmem:[#allocation1 + $0x38] sm:$0xff pattern:$0x75316420]  ;;  %v452_v18 = vld.sshfl [vmem:[#allocation1 + $0x30] sm:$0xff pattern:$0x75316420]  ;;  %v466_v57 = vmul.f32 %v448_v43, %v1836_v15  ;;  %v467_v7 = vmul.f32 %v449_v26, %v1859_v34 }
  0x7e   :  { %v525_v29 = vrot.slane %v431_v53, 4  ;;  %v282_v55 = vadd.f32 %v281_v23, %v280_v50  ;;  %v440_v45 = vld.sshfl [vmem:[#allocation1] sm:$0xff pattern:$0x75316420]  ;;  %478 = vst [vmem:[#allocation1 + $0x20] ss:$2 sm:$0xff] %v2148_v62  ;;  %v468_v40 = vmul.f32 %v452_v18, %v1838_v16  ;;  %v469_v32 = vmul.f32 %v453_v35, %v2154_v20  ;;  %990 = vmatpush.bf16.msrb.mxu0 %v1215_v56 }
  0x7f   :  { %v526_v54 = vrot.slane %v438_v28, 4  ;;  %v441_v60 = vld.sshfl [vmem:[#allocation1 + $0x8] sm:$0xff pattern:$0x75316420]  ;;  %482 = vst [vmem:[#allocation1 + $0x30] ss:$2 sm:$0xff] %v2149_v46  ;;  %v275_v11 = vadd.f32 %v267_v47, %v236_v5 }
  0x80   :  { %529 = vst [vmem:[#allocation2 + $0x10] sm:$0xf0] %v525_v29  ;;  %v292_v2 = vsub.f32 0.0, %v282_v55  ;;  %v444_v14 = vld.sshfl [vmem:[#allocation1 + $0x10] sm:$0xff pattern:$0x75316420] }
  0x81   :  { %530 = vst [vmem:[#allocation2] sm:$0xf0] %v526_v54  ;;  %v445_v39 = vld.sshfl [vmem:[#allocation1 + $0x18] sm:$0xff pattern:$0x75316420]  ;;  %v283_v6 = vsel %vm191_vm4, %v269_v36, 0.0 }
  0x82   :  { %294 = vst [vmem:[#allocation2 + $0x18] sm:$0xf] %v292_v2  ;;  %v284_v59 = vsel %vm191_vm4, %v271_v10, 0.0  ;;  %v288_v21 = vsel %vm191_vm4, %v275_v11, 0.0  ;;  %v2152_v0 = vperm.slane %v1895_v61, 0  ;;  %v2153_v41 = vperm.slane %v1904_v13, 0 }
  0x83   :  { %470 = vst [vmem:[#allocation1] ss:$2 sm:$0xff] %v2150_v63  ;;  %v285_v19 = vadd.f32 %v284_v59, %v283_v6  ;;  %v1456_v16 = vld [vmem:[%s2099_s3 + $0x8] sm:$0xf]  ;;  %v1478_v12 = vld [vmem:[#allocation3 + $0xa4] sm:$0xf] }
  0x84   :  { %474 = vst [vmem:[#allocation1 + $0x10] ss:$2 sm:$0xff] %v2151_v38  ;;  %1136 = vperm.xlu0 %1546, %v1456_v16   ;;  %v1276_v27 = vld [vmem:[#allocation3 + $0xa8] sm:$0xf0]  ;;  %v1496_v23 = vld [vmem:[#allocation3 + $0x134] sm:$0xf] }
  0x85   :  { %v479_v8 = vld.sshfl [vmem:[#allocation1 + $0x20] sm:$0xff pattern:$0x75316420]  ;;  %v287_v3 = vadd.f32 %v286_v42, %v285_v19  ;;  %v480_v17 = vld.sshfl [vmem:[#allocation1 + $0x28] sm:$0xff pattern:$0x75316420] }
  0x86   :  { %v483_v48 = vld.sshfl [vmem:[#allocation1 + $0x30] sm:$0xff pattern:$0x75316420]  ;;  %v497_v37 = vmul.f32 %v479_v8, %v2152_v0  ;;  %v484_v1 = vld.sshfl [vmem:[#allocation1 + $0x38] sm:$0xff pattern:$0x75316420]  ;;  %v498_v15 = vmul.f32 %v480_v17, %v375_v4 }
  0x87   :  { %v541_v25 = vld [vmem:[#allocation2 + $0x10] sm:$0xff]  ;;  %v499_v34 = vmul.f32 %v483_v48, %v2153_v41  ;;  %v289_v58 = vadd.f32 %v288_v21, %v287_v3  ;;  %v500_v61 = vmul.f32 %v484_v1, %v377_v52  ;;  %v1348_v43 = vld [vmem:[#allocation3 + $0x138] sm:$0xf0]  ;;  %v1279_v52 = vor.u32 %v1478_v12, %v1276_v27  ;;  %v2160_v54 = vld [vmem:[#allocation15_spill] sm:$0xff] }
  0x88   :  { %v2034_v9 = vpack.c.bf16 %v541_v25, %v541_v25  ;;  %v542_v30 = vld [vmem:[#allocation2] sm:$0xff]  ;;  %v505_v51 = vadd.f32 %v497_v37, %v466_v57  ;;  %v506_v4 = vadd.f32 %v498_v15, %v467_v7  ;;  %v2155_v33 = vld [vmem:[#allocation13_spill] sm:$0xff]  ;;  %v2157_v28 = vld [vmem:[#allocation14_spill] sm:$0xff]  ;;  %v1351_v36 = vor.u32 %v1496_v23, %v1348_v43 }
  0x89   :  { %v2038_v5 = vpack.c.bf16 %v542_v30, %v542_v30  ;;  %v2156_v47 = vperm.slane %v2155_v33, 0  ;;  %v507_v26 = vadd.f32 %v499_v34, %v468_v40  ;;  %v293_v50 = vsub.f32 0.0, %v289_v58  ;;  %v1512_v29 = vld [vmem:[#allocation3 + $0x1b4] sm:$0xf]  ;;  %1003 = vmatpush.bf16.msrb.mxu1 %v1279_v52  ;;  %v1204_v40 = vld [vmem:[#allocation3 + $0x18] sm:$0xf0] }
  0x8a   :  { %941 = vmatmul.bf16.vlgmr.msra.gmra.mxu0 %v2034_v9  ;;  %v464_v35 = vmul.f32 %v444_v14, %v2157_v28  ;;  %v471_v18 = vld.sshfl [vmem:[#allocation1] sm:$0xff pattern:$0x75316420]  ;;  %v512_v13 = vsel %vm191_vm4, %v505_v51, 0.0  ;;  %v2158_v62 = vperm.slane %v1891_v49, 0  ;;  %v465_v46 = vmul.f32 %v445_v39, %v2160_v54  ;;  %1015 = vmatpush.bf16.msrb.mxu2 %v1351_v36 }
  0x8b   :  { %v462_v53 = vmul.f32 %v440_v45, %v2156_v47  ;;  %954 = vmatmul.bf16.vlgmr.msra.gmra.mxu1 %v2038_v5  ;;  %v475_v55 = vld.sshfl [vmem:[#allocation1 + $0x10] sm:$0xff pattern:$0x75316420]  ;;  %295 = vst [vmem:[#allocation2 + $0x8] sm:$0xf] %v293_v50  ;;  %v2159_v45 = vperm.slane %v2155_v33, 1  ;;  %v508_v42 = vadd.f32 %v500_v61, %v469_v32 }
  0x8c   :  { %v493_v10 = vmul.f32 %v471_v18, %v2158_v62  ;;  %v519_v11 = vsel %vm191_vm4, %v506_v4, 0.0  ;;  %v2161_v2 = vperm.slane %v1893_v31, 0  ;;  %v472_v6 = vld.sshfl [vmem:[#allocation1 + $0x8] sm:$0xff pattern:$0x75316420]  ;;  %v514_v19 = vsel %vm191_vm4, %v507_v26, 0.0 }
  0x8d   :  { %v463_v44 = vmul.f32 %v441_v60, %v2159_v45  ;;  %v476_v59 = vld.sshfl [vmem:[#allocation1 + $0x18] sm:$0xff pattern:$0x75316420]  ;;  %v2162_v21 = vperm.slane %v1891_v49, 1  ;;  %v2163_v60 = vperm.slane %v1893_v31, 1  ;;  %v521_v15 = vsel %vm191_vm4, %v508_v42, 0.0 }
  0x8e   :  { %v495_v14 = vmul.f32 %v475_v55, %v2161_v2  ;;  %v501_v63 = vadd.f32 %v493_v10, %v462_v53  ;;  %v1412_v39 = vld [vmem:[#allocation3 + $0x1b8] sm:$0xf0]  ;;  %v1460_v7 = vld [vmem:[#allocation3 + $0x14] sm:$0xf]  ;;  %v1494_v37 = vld [vmem:[#allocation3 + $0x124] sm:$0xf] }
  0x8f   :  { %v494_v57 = vmul.f32 %v472_v6, %v2162_v21  ;;  %v496_v38 = vmul.f32 %v476_v59, %v2163_v60  ;;  %v1415_v22 = vor.u32 %v1512_v29, %v1412_v39  ;;  %v1476_v8 = vld [vmem:[#allocation3 + $0x94] sm:$0xf]  ;;  %v1268_v3 = vld [vmem:[#allocation3 + $0x98] sm:$0xf0]  ;;  %v1207_v0 = vor.u32 %v1460_v7, %v1204_v40  ;;  %v1340_v1 = vld [vmem:[#allocation3 + $0x128] sm:$0xf0] }
  0x90   :  { %v503_v24 = vadd.f32 %v495_v14, %v464_v35  ;;  %v509_v17 = vsel %vm191_vm4, %v501_v63, 0.0  ;;  %v1271_v31 = vor.u32 %v1476_v8, %v1268_v3  ;;  %v1343_v25 = vor.u32 %v1494_v37, %v1340_v1  ;;  %v1510_v41 = vld [vmem:[#allocation3 + $0x1a4] sm:$0xf]  ;;  %v1404_v34 = vld [vmem:[#allocation3 + $0x1a8] sm:$0xf0] }
  0x91   :  { %v502_v56 = vadd.f32 %v494_v57, %v463_v44  ;;  %v504_v48 = vadd.f32 %v496_v38, %v465_v46  ;;  %1028 = vmatpush.bf16.msrb.mxu3 %v1415_v22  ;;  %991 = vmatpush.bf16.msrb.mxu0 %v1207_v0  ;;  %v1407_v16 = vor.u32 %v1510_v41, %v1404_v34  ;;  %v1450_v12 = vld [vmem:[%s2099_s3 + $0x8] sm:$0xf]  ;;  %v1451_v30 = vld [vmem:[%s2099_s3 + $0xc] sm:$0xf]  ;;  %v1196_v4 = vld [vmem:[#allocation3 + $0x8] sm:$0xf0]  ;;  %v1117_v38 = vpop.permute.xlu1 %1116 }
  0x92   :  { %v510_v49 = vsel %vm191_vm4, %v503_v24, 0.0  ;;  %1004 = vmatpush.bf16.msrb.mxu1 %v1271_v31  ;;  %1016 = vmatpush.bf16.msrb.mxu2 %v1343_v25  ;;  %v1458_v61 = vld [vmem:[#allocation3 + $0x4] sm:$0xf]  ;;  %v1260_v47 = vld [vmem:[#allocation3 + $0x88] sm:$0xf0] }
  0x93   :  { %v511_v58 = vadd.f32 %v510_v49, %v509_v17  ;;  %v516_v20 = vsel %vm191_vm4, %v502_v56, 0.0  ;;  %v517_v32 = vsel %vm191_vm4, %v504_v48, 0.0  ;;  %v1474_v27 = vld [vmem:[#allocation3 + $0x84] sm:$0xf]  ;;  %1075 = vperm.xlu1 %1547, %v1450_v12   ;;  %1088 = vperm.xlu0 %1546, %v1451_v30   ;;  %v1199_v33 = vor.u32 %v1458_v61, %v1196_v4  ;;  %v1492_v53 = vld [vmem:[#allocation3 + $0x114] sm:$0xf] }
  0x94   :  { %v518_v51 = vadd.f32 %v517_v32, %v516_v20  ;;  %v1332_v26 = vld [vmem:[#allocation3 + $0x118] sm:$0xf0]  ;;  %v1263_v43 = vor.u32 %v1474_v27, %v1260_v47  ;;  %v1508_v35 = vld [vmem:[#allocation3 + $0x194] sm:$0xf]  ;;  %v1490_v52 = vld [vmem:[#allocation3 + $0x104] sm:$0xf] }
  0x95   :  { %v513_v23 = vadd.f32 %v512_v13, %v511_v58  ;;  %1029 = vmatpush.bf16.msrb.mxu3 %v1407_v16  ;;  %v1335_v28 = vor.u32 %v1492_v53, %v1332_v26  ;;  %v1396_v18 = vld [vmem:[#allocation3 + $0x198] sm:$0xf0]  ;;  %992 = vmatpush.bf16.msrb.mxu0 %v1199_v33  ;;  %v1324_v55 = vld [vmem:[#allocation3 + $0x108] sm:$0xf0]  ;;  %v1506_v62 = vld [vmem:[#allocation3 + $0x184] sm:$0xf] }
  0x96   :  { %v520_v50 = vadd.f32 %v519_v11, %v518_v51  ;;  %v1399_v29 = vor.u32 %v1508_v35, %v1396_v18  ;;  %v1388_v10 = vld [vmem:[#allocation3 + $0x188] sm:$0xf0]  ;;  %1005 = vmatpush.bf16.msrb.mxu1 %v1263_v43  ;;  %v1327_v45 = vor.u32 %v1490_v52, %v1324_v55  ;;  %v1448_v44 = vld [vmem:[%s2099_s3 + $0x10] sm:$0xf]  ;;  %v1449_v6 = vld [vmem:[%s2099_s3 + $0x4] sm:$0xf] }
  0x97   :  { %v515_v36 = vadd.f32 %v514_v19, %v513_v23  ;;  %1017 = vmatpush.bf16.msrb.mxu2 %v1335_v28  ;;  %1053 = vperm.xlu2 %1548, %v1448_v44   ;;  %v1391_v11 = vor.u32 %v1506_v62, %v1388_v10  ;;  %v1457_v21 = vld [vmem:[%s2099_s3 + $0xc] sm:$0xf]  ;;  %v1452_v39 = vld [vmem:[%s2096_s0 + $0x30] sm:$0xf]  ;;  %v1453_v32 = vld [vmem:[%s2096_s0 + $0x38] sm:$0xf] }
  0x98   :  { %v522_v13 = vadd.f32 %v521_v15, %v520_v50  ;;  %v1110_v40 = vperm.slane %v1452_v39, 0  ;;  %v1037_v8 = vld [vmem:[%s2096_s0 + $0x10] sm:$0xf]  ;;  %v1127_v48 = vperm.slane %v1452_v39, 1  ;;  %v1139_v41 = vperm.slane %v1452_v39, 2 }
  0x99   :  { %v531_v54 = vsub.f32 0.0, %v515_v36  ;;  %1030 = vmatpush.bf16.msrb.mxu3 %v1399_v29  ;;  %v1047_v0 = vperm.slane %v1037_v8, 0  ;;  %v1065_v34 = vperm.slane %v1037_v8, 1  ;;  %v1078_v20 = vperm.slane %v1037_v8, 2  ;;  %v1038_v53 = vld [vmem:[%s2096_s0 + $0x18] sm:$0xf] }
  0x9a   :  { %v532_v46 = vsub.f32 0.0, %v522_v13  ;;  %993 = vmatmul.bf16.vlgmr.msrb.gmra.mxu0 %v2034_v9  ;;  %v1108_v9 = vpop.permute.xlu0 %1107  ;;  %v1151_v51 = vperm.slane %v1452_v39, 3  ;;  %v1111_v33 = vperm.slane %v1453_v32, 0  ;;  %v1091_v47 = vperm.slane %v1037_v8, 3  ;;  %s1605_s0 = smov [#allocation6]  }
  0x9b   :  { %v535_v2 = vrot.slane %v531_v54, 4  ;;  %1018 = vmatpush.bf16.msrb.mxu2 %v1327_v45  ;;  %1006 = vmatmul.bf16.vlgmr.msrb.gmra.mxu1 %v2038_v5  ;;  %v1112_v17 = vmul.f32 %v1110_v40, %v1108_v9  ;;  %v1048_v36 = vperm.slane %v1038_v53, 0  ;;  %v1128_v29 = vperm.slane %v1453_v32, 1  ;;  %s1172_s17 = sshll.u32 %s1605_s0, 4  ;;  %s1173_s17 = int_to_ptr.vmem [resolvable:$true] %s1172_s17 }
  0x9c   :  { %v536_v14 = vrot.slane %v532_v46, 4  ;;  %v1113_v52 = vmul.f32 %v1111_v33, %v1108_v9  ;;  %v1079_v9 = vperm.slane %v1038_v53, 2 }
  0x9d   :  { %539 = vst [vmem:[#allocation2 + $0x18] sm:$0xf0] %v535_v2  ;;  %1031 = vmatpush.bf16.msrb.mxu3 %v1391_v11  ;;  %v1119_v49 = vadd.f32 %v1117_v38, %v1112_v17  ;;  %v1140_v2 = vperm.slane %v1453_v32, 2 }
  0x9e   :  { %540 = vst [vmem:[#allocation2 + $0x8] sm:$0xf0] %v536_v14  ;;  %v1120_v54 = vadd.f32 %v1117_v38, %v1113_v52  ;;  %v1066_v14 = vperm.slane %v1038_v53, 1  ;;  %v1092_v38 = vperm.slane %v1038_v53, 3 }
  0x9f   :  { %1062 = vperm.xlu2 %1548, %v1449_v6  }
  0xa2   :  { %v1045_v24 = vpop.permute.xlu0 %1044 }
  0xa3   :  { %v1049_v25 = vmul.f32 %v1047_v0, %v1045_v24  ;;  %v1050_v46 = vmul.f32 %v1048_v36, %v1045_v24 }
  0xa4   :  { %v543_v59 = vld [vmem:[#allocation2 + $0x18] sm:$0xff] }
  0xa5   :  { %v547_v42 = vpack.c.bf16 %v543_v59, %v543_v59  ;;  %v544_v63 = vld [vmem:[#allocation2 + $0x8] sm:$0xff] }
  0xa6   :  { %v548_v19 = vpack.c.bf16 %v544_v63, %v544_v63 }
  0xa7   :  { %967 = vmatmul.bf16.vlgmr.msra.gmra.mxu2 %v547_v42  ;;  %1148 = vperm.xlu2 %1548, %v1457_v21  }
  0xa8   :  { %980 = vmatmul.bf16.vlgmr.msra.gmra.mxu3 %v548_v19 }
  0xb7   :  { %1019 = vmatmul.bf16.vlgmr.msrb.gmra.mxu2 %v547_v42 }
  0xb8   :  { %1032 = vmatmul.bf16.vlgmr.msrb.gmra.mxu3 %v548_v19 }
  0xde   :  { %v1125_v56 = vpop.permute.xlu1 %1124 }
  0xdf   :  { %v1129_v15 = vmul.f32 %v1127_v48, %v1125_v56  ;;  %v1130_v11 = vmul.f32 %v1128_v29, %v1125_v56 }
  0xe1   :  { %v1131_v58 = vadd.f32 %v1129_v15, %v1119_v49  ;;  %v1132_v21 = vadd.f32 %v1130_v11, %v1120_v54 }
  0xf1   :  { %v1054_v60 = vpop.permute.xlu2 %1053 }
  0xf2   :  { %v1056_v16 = vadd.f32 %v1054_v60, %v1049_v25 }
  0xf6   :  { %v1137_v31 = vpop.permute.xlu0 %1136 }
  0xf7   :  { %v1141_v12 = vmul.f32 %v1139_v41, %v1137_v31 }
  0xf9   :  { %v1063_v3 = vpop.permute.xlu2 %1062  ;;  %v1143_v26 = vadd.f32 %v1141_v12, %v1131_v58 }
  0xfa   :  { %v1067_v30 = vmul.f32 %v1065_v34, %v1063_v3  ;;  %v1068_v39 = vmul.f32 %v1066_v14, %v1063_v3 }
  0xfc   :  { %v1069_v50 = vadd.f32 %v1067_v30, %v1056_v16 }
 0x101   :  { %v1149_v61 = vpop.permute.xlu2 %1148 }
 0x102   :  { %v1153_v28 = vmul.f32 %v1151_v51, %v1149_v61 }
 0x104   :  { %v1155_v10 = vadd.f32 %v1153_v28, %v1143_v26 }
 0x105   :  { %v1076_v27 = vpop.permute.xlu1 %1075  ;;  %v1089_v35 = vpop.permute.xlu0 %1088 }
 0x106   :  { %v1080_v43 = vmul.f32 %v1078_v20, %v1076_v27  ;;  %v1093_v62 = vmul.f32 %v1091_v47, %v1089_v35  ;;  %v1159_v59 = vrot.slane %v1155_v10, 4  ;;  %v1081_v17 = vmul.f32 %v1079_v9, %v1076_v27 }
 0x107   :  { %v942_v5 = vpop.f32.mrf.mxu0  ;;  %v1094_v49 = vmul.f32 %v1092_v38, %v1089_v35 }
 0x108   :  { %v955_v57 = vpop.f32.mrf.mxu1  ;;  %v1082_v55 = vadd.f32 %v1080_v43, %v1069_v50 }
 0x109   :  { %v956_v18 = vadd.f32 %v955_v57, %v942_v5  ;;  %v1057_v5 = vadd.f32 %v1054_v60, %v1050_v46  ;;  %v1142_v57 = vmul.f32 %v1140_v2, %v1137_v31 }
 0x10a   :  { %v1095_v6 = vadd.f32 %v1093_v62, %v1082_v55 }
 0x10b   :  { %v1144_v24 = vadd.f32 %v1142_v57, %v1132_v21  ;;  %v1070_v8 = vadd.f32 %v1068_v39, %v1057_v5 }
 0x10d   :  { %v1083_v0 = vadd.f32 %v1081_v17, %v1070_v8 }
 0x10f   :  { %v944_v7 = vpop.f32.mrf.mxu0  ;;  %v1096_v60 = vadd.f32 %v1094_v49, %v1083_v0 }
 0x110   :  { %v957_v22 = vpop.f32.mrf.mxu1  ;;  %v1152_v7 = vperm.slane %v1453_v32, 3 }
 0x112   :  { %v1154_v56 = vmul.f32 %v1152_v7, %v1149_v61 }
 0x114   :  { %v1156_v15 = vadd.f32 %v1154_v56, %v1144_v24 }
 0x116   :  { %v1160_v31 = vrot.slane %v1156_v15, 4 }
 0x117   :  { %v994_v37 = vpop.f32.mrf.mxu0 }
 0x118   :  { %v1007_v1 = vpop.f32.mrf.mxu1 }
 0x119   :  { %v1008_v48 = vadd.f32 %v1007_v1, %v994_v37 }
 0x11f   :  { %v996_v4 = vpop.f32.mrf.mxu0 }
 0x120   :  { %v1009_v23 = vpop.f32.mrf.mxu1 }
 0x12a   :  { %v968_v13 = vpop.f32.mrf.mxu2 }
 0x12b   :  { %v969_v45 = vadd.f32 %v968_v13, %v956_v18  ;;  %v981_v44 = vpop.f32.mrf.mxu3 }
 0x12d   :  { %v982_v42 = vadd.f32 %v981_v44, %v969_v45 }
 0x12f   :  { %v1097_v63 = vadd.f32 %v1095_v6, %v982_v42  ;;  %v1163_v19 = vadd.f32 %v1159_v59, %v982_v42 }
 0x131   :  { %1099 = vst [vmem:[#allocation6] sm:$0xf] %v1097_v63 }
 0x132   :  { %1165 = vst [vmem:[#allocation6] sm:$0xf0] %v1163_v19  ;;  %v970_v22 = vpop.f32.mrf.mxu2 }
 0x133   :  { %v983_v40 = vpop.f32.mrf.mxu3 }
 0x13a   :  { %v1020_v25 = vpop.f32.mrf.mxu2 }
 0x13b   :  { %v1021_v41 = vadd.f32 %v1020_v25, %v1008_v48  ;;  %v1033_v34 = vpop.f32.mrf.mxu3 }
 0x13d   :  { %v1034_v3 = vadd.f32 %v1033_v34, %v1021_v41 }
 0x13f   :  { %v1098_v58 = vadd.f32 %v1096_v60, %v1034_v3  ;;  %v1164_v20 = vadd.f32 %v1160_v31, %v1034_v3 }
 0x141   :  { %1100 = vst [vmem:[#allocation6 + $0x8] sm:$0xf] %v1098_v58 }
 0x142   :  { %1166 = vst [vmem:[#allocation6 + $0x8] sm:$0xf0] %v1164_v20  ;;  %v1022_v37 = vpop.f32.mrf.mxu2 }
 0x143   :  { %v1035_v1 = vpop.f32.mrf.mxu3  ;;  %1177 = dma.vmem_to_hbm [thread:$0]  %s1173_s17, 256, %s1175_s20, [#allocation5]  }
 0x144   :  { %1599 = dma.done.wait [#allocation5], 256  }
 0x145   :  { %1600 = vsyncadd [#allocation5], 4294967040 }
 0x146   :  { %1182 = vsyncpa [#allocation4], 1 }
 0x147   :  { %1183 = vsyncpa [#allocation5], 1 }

</bundles_post_ra>
